<compile_context>
chip_gen: v7x
topology: tpu7x:2x2x1
jax: 0.10.0
libtpu: 0.0.40
codegen_flags: <defaults>
</compile_context>

<pallas_src>
import functools

import jax
import jax.numpy as jnp
import numpy as np
from jax import lax
from jax.experimental import pallas as pl
from jax.experimental.pallas import tpu as pltpu

BN_EPS = 1e-5


def _vmem_limit_bytes():
    """Generation-aware scoped-VMEM limit (headroom vs. physical capacity)."""
    try:
        cap = int(pltpu.get_tpu_info().vmem_capacity_bytes)
    except Exception:
        cap = 64 * 1024 * 1024  # assume the most restrictive (v7x) physical size
    # ~40 MiB on v7x (64 MiB physical), 80 MiB on v5e/v6e (128 MiB physical).
    return max(16 * 1024 * 1024, min((cap * 5) // 8, 96 * 1024 * 1024))


_VMEM_LIMIT = _vmem_limit_bytes()


# ----------------------------- Pallas kernels ------------------------------

def _zero_border(pad_ref, hi, wi, cin):
    """Zero only the 1-px border of a (hi+2, wi+2, cin) conv-pad scratch."""
    zrow = jnp.zeros((1, wi + 2, cin), jnp.float32)
    pad_ref[0:1, :, :] = zrow
    pad_ref[hi + 1:hi + 2, :, :] = zrow
    zcol = jnp.zeros((hi + 2, 1, cin), jnp.float32)
    pad_ref[:, 0:1, :] = zcol
    pad_ref[:, wi + 1:wi + 2, :] = zcol


def _im2col_matmul(pad_ref, patch_ref, w_ref, ho, wo):
    """3x3 conv as ONE matmul: gather the 9 shifted taps of the zero-padded
    (ho+2, wo+2, cin) scratch into a bf16 (ho*wo, 9*cin) im2col scratch, then
    a single K=9*cin MXU matmul with f32 accumulation."""
    cin = pad_ref.shape[-1]
    for t in range(9):
        dy, dx = t // 3, t % 3
        tap = pad_ref[dy:dy + ho, dx:dx + wo, :].reshape(ho * wo, cin)
        patch_ref[:, t * cin:(t + 1) * cin] = tap.astype(jnp.bfloat16)
    return jnp.dot(patch_ref[...], w_ref[...],
                   preferred_element_type=jnp.float32)


def _stats_of(acc):
    # per-block sum and sum-of-squares over all spatial positions -> (2, cout)
    return jnp.concatenate(
        [jnp.sum(acc, axis=0, keepdims=True),
         jnp.sum(acc * acc, axis=0, keepdims=True)], axis=0)


def _pool_conv_stats_kernel(x_ref, w_ref, y_ref, stats_ref,
                            xpad_ref, ppad_ref, patch_ref):
    # x_ref: (H, W, Cin) bf16 image, w_ref: (9*Cin, Cout) bf16
    # y_ref: (Ho, Wo, Cout) bf16 raw conv output, stats_ref: (2, Cout) f32
    ho, wo, cout = y_ref.shape
    h, w, cin = x_ref.shape
    # -- -inf pooling halo built in VMEM (top/left only; H, W even) ----------
    xpad_ref[0:1, :, :] = jnp.full((1, w + 1, cin), -jnp.inf, jnp.float32)
    xpad_ref[:, 0:1, :] = jnp.full((h + 1, 1, cin), -jnp.inf, jnp.float32)
    xpad_ref[1:h + 1, 1:w + 1, :] = x_ref[...].astype(jnp.float32)
    # -- MaxPool2d(kernel=3, stride=2, padding=1): 9 strided taps -------------
    # (separable pooling would need strided value slices or an extra scratch
    #  write; the 9 strided ref reads are the proven/cheap pattern here)
    m = xpad_ref[pl.ds(0, ho, stride=2), pl.ds(0, wo, stride=2), :]
    for dy in range(3):
        for dx in range(3):
            if dy == 0 and dx == 0:
                continue
            m = jnp.maximum(
                m,
                xpad_ref[pl.ds(dy, ho, stride=2), pl.ds(dx, wo, stride=2), :])
    # -- conv1: zero padding lives only in the scratch border -----------------
    _zero_border(ppad_ref, ho, wo, cin)
    ppad_ref[1:ho + 1, 1:wo + 1, :] = m
    acc = _im2col_matmul(ppad_ref, patch_ref, w_ref, ho, wo)
    y_ref[...] = acc.reshape(ho, wo, cout).astype(y_ref.dtype)
    stats_ref[...] = _stats_of(acc)


def _affine_conv_stats_kernel(x_ref, scale_ref, shift_ref, w_ref,
                              y_ref, stats_ref, apad_ref, patch_ref,
                              *, apply_relu):
    # x_ref: (H, W, Cin) bf16; scale/shift: (1, Cin) f32 folded BN affine of the
    # previous layer (identity when apply_relu=False is used as "no BN").
    h, w, cin = x_ref.shape
    cout = y_ref.shape[-1]
    a = x_ref[...].astype(jnp.float32) * scale_ref[...] + shift_ref[...]
    if apply_relu:
        a = jnp.maximum(a, 0.0)
    _zero_border(apad_ref, h, w, cin)
    apad_ref[1:h + 1, 1:w + 1, :] = a
    acc = _im2col_matmul(apad_ref, patch_ref, w_ref, h, w)
    y_ref[...] = acc.reshape(h, w, cout).astype(y_ref.dtype)
    stats_ref[...] = _stats_of(acc)


def _affine_relu_kernel(y_ref, s_ref, b_ref, o_ref):
    # lane-dense elementwise BN-affine + ReLU on a (rows, W*C) view
    o_ref[...] = jnp.maximum(
        y_ref[...].astype(jnp.float32) * s_ref[...] + b_ref[...], 0.0
    ).astype(o_ref.dtype)


# ------------------------------ JAX wrappers --------------------------------

def _conv_weight_mat(w_oihw):
    """(Cout, Cin, 3, 3) -> (9*Cin, Cout) bf16; row index = (dy*3+dx)*Cin + ci."""
    cout, cin = w_oihw.shape[0], w_oihw.shape[1]
    return jnp.transpose(w_oihw, (2, 3, 1, 0)).reshape(9 * cin, cout).astype(
        jnp.bfloat16)


def _pool_conv_stats(x_nhwc, w_oihw):
    n, h, w, cin = x_nhwc.shape
    cout = w_oihw.shape[0]
    assert h % 2 == 0 and w % 2 == 0, "downsample path expects even H, W"
    ho, wo = h // 2, w // 2
    wt = _conv_weight_mat(w_oihw)
    return pl.pallas_call(
        _pool_conv_stats_kernel,
        out_shape=(jax.ShapeDtypeStruct((n, ho, wo, cout), jnp.bfloat16),
                   jax.ShapeDtypeStruct((n, 2, cout), jnp.float32)),
        grid=(n,),
        in_specs=[
            pl.BlockSpec((None, h, w, cin), lambda i: (i, 0, 0, 0)),
            pl.BlockSpec((9 * cin, cout), lambda i: (0, 0)),
        ],
        out_specs=(
            pl.BlockSpec((None, ho, wo, cout), lambda i: (i, 0, 0, 0)),
            pl.BlockSpec((None, 2, cout), lambda i: (i, 0, 0)),
        ),
        scratch_shapes=[
            pltpu.VMEM((h + 1, w + 1, cin), jnp.float32),    # -inf padded input
            pltpu.VMEM((ho + 2, wo + 2, cin), jnp.float32),  # zero-bordered pool map
            pltpu.VMEM((ho * wo, 9 * cin), jnp.bfloat16),    # im2col patches
        ],
        compiler_params=pltpu.CompilerParams(
            dimension_semantics=("parallel",),
            vmem_limit_bytes=_VMEM_LIMIT),
    )(x_nhwc, wt)


def _affine_conv_stats(x_nhwc, scale, shift, w_oihw, apply_relu):
    n, h, w, cin = x_nhwc.shape
    cout = w_oihw.shape[0]
    wt = _conv_weight_mat(w_oihw)
    kernel = functools.partial(_affine_conv_stats_kernel,
                               apply_relu=apply_relu)
    return pl.pallas_call(
        kernel,
        out_shape=(jax.ShapeDtypeStruct((n, h, w, cout), jnp.bfloat16),
                   jax.ShapeDtypeStruct((n, 2, cout), jnp.float32)),
        grid=(n,),
        in_specs=[
            pl.BlockSpec((None, h, w, cin), lambda i: (i, 0, 0, 0)),
            pl.BlockSpec((1, cin), lambda i: (0, 0)),
            pl.BlockSpec((1, cin), lambda i: (0, 0)),
            pl.BlockSpec((9 * cin, cout), lambda i: (0, 0)),
        ],
        out_specs=(
            pl.BlockSpec((None, h, w, cout), lambda i: (i, 0, 0, 0)),
            pl.BlockSpec((None, 2, cout), lambda i: (i, 0, 0)),
        ),
        scratch_shapes=[
            pltpu.VMEM((h + 2, w + 2, cin), jnp.float32),    # zero-bordered activation
            pltpu.VMEM((h * w, 9 * cin), jnp.bfloat16),      # im2col patches
        ],
        compiler_params=pltpu.CompilerParams(
            dimension_semantics=("parallel",),
            vmem_limit_bytes=_VMEM_LIMIT),
    )(x_nhwc, scale, shift, wt)


def _bn_scale_shift(stats, gamma, beta, count):
    """Fold train-mode BN (batch stats, biased var) into per-channel affine."""
    s = jnp.sum(stats, axis=0)                            # (2, C)
    mean = s[0] / count
    var = jnp.maximum(s[1] / count - mean * mean, 0.0)    # biased variance
    scale = gamma.astype(jnp.float32) * lax.rsqrt(var + BN_EPS)
    shift = beta.astype(jnp.float32) - mean * scale
    c = scale.shape[0]
    return scale.reshape(1, c), shift.reshape(1, c)


def _pick_row_tile(rows, lanes, itemsize, budget):
    """Largest legal row tile under a VMEM byte budget (~4 resident buffers)."""
    cap = max(1, budget // max(1, 4 * lanes * itemsize))
    if rows <= cap:
        return rows                       # full rows: always a legal block dim
    best = 0
    t = 8
    while t <= min(cap, rows):
        if rows % t == 0:
            best = t
        t += 8
    return best if best else rows         # rare fallback for awkward shapes


def _affine_relu(y_nhwc, scale, shift, out_dtype):
    n, h, w, c = y_nhwc.shape
    rows, lanes = n * h, w * c
    yf = y_nhwc.reshape(rows, lanes)
    srow = jnp.tile(scale, (1, w))   # (1, w*c): lane-dense affine params
    brow = jnp.tile(shift, (1, w))
    tm = _pick_row_tile(rows, lanes, 4, _VMEM_LIMIT // 2)
    out = pl.pallas_call(
        _affine_relu_kernel,
        out_shape=jax.ShapeDtypeStruct((rows, lanes), out_dtype),
        grid=(rows // tm,),
        in_specs=[pl.BlockSpec((tm, lanes), lambda i: (i, 0)),
                  pl.BlockSpec((1, lanes), lambda i: (0, 0)),
                  pl.BlockSpec((1, lanes), lambda i: (0, 0))],
        out_specs=pl.BlockSpec((tm, lanes), lambda i: (i, 0)),
        compiler_params=pltpu.CompilerParams(
            dimension_semantics=("parallel",),
            vmem_limit_bytes=_VMEM_LIMIT),
    )(yf, srow, brow)
    return out.reshape(n, h, w, c)


@functools.partial(jax.jit, static_argnames=("downsample",))
def encoder_block_forward(x_nchw, w1, g1, b1, w2, g2, b2, downsample=True):
    """_EncoderBlock.forward: [maxpool] -> (conv3x3+BN+ReLU) x 2. NCHW in/out."""
    # bf16 activations feed the MXU; f32 accumulation / BN stats keep accuracy.
    x = jnp.transpose(x_nchw, (0, 2, 3, 1)).astype(jnp.bfloat16)  # NCHW -> NHWC
    if downsample:
        y1, st1 = _pool_conv_stats(x, w1)
    else:
        cin = x.shape[-1]
        ident = jnp.ones((1, cin), jnp.float32)
        zero = jnp.zeros((1, cin), jnp.float32)
        y1, st1 = _affine_conv_stats(x, ident, zero, w1, apply_relu=False)
    n, ho, wo, _ = y1.shape
    cnt = n * ho * wo
    sc1, sh1 = _bn_scale_shift(st1, g1, b1, cnt)
    # conv2 with BN1 + ReLU fused into its input path (no extra HBM round trip)
    y2, st2 = _affine_conv_stats(y1, sc1, sh1, w2, apply_relu=True)
    sc2, sh2 = _bn_scale_shift(st2, g2, b2, cnt)
    out = _affine_relu(y2, sc2, sh2, x_nchw.dtype)
    return jnp.transpose(out, (0, 3, 1, 2))  # NHWC -> NCHW


# --------------------------- plain-JAX reference ----------------------------

def _reference_forward(x_nchw, w1, g1, b1, w2, g2, b2):
    x = jnp.transpose(x_nchw, (0, 2, 3, 1))
    x = lax.reduce_window(x, -jnp.inf, lax.max, (1, 3, 3, 1), (1, 2, 2, 1),
                          padding=((0, 0), (1, 1), (1, 1), (0, 0)))

    def cbr(x, w, g, b):
        y = lax.conv_general_dilated(
            x, jnp.transpose(w, (2, 3, 1, 0)), (1, 1), ((1, 1), (1, 1)),
            dimension_numbers=("NHWC", "HWIO", "NHWC"),
            precision=lax.Precision.HIGHEST)
        m = jnp.mean(y, axis=(0, 1, 2), keepdims=True)
        v = jnp.var(y, axis=(0, 1, 2), keepdims=True)
        y_hat = (y - m) * lax.rsqrt(v + BN_EPS)
        return jnp.maximum(y_hat * g + b, 0.0)

    x = cbr(x, w1, g1, b1)
    x = cbr(x, w2, g2, b2)
    return jnp.transpose(x, (0, 3, 1, 2))


# ---------------------------------- main -------------------------------------

if __name__ == "__main__":
    key = jax.random.PRNGKey(0)
    N, Cin, H, W = 2, 4, 16, 16
    Cout = 8

    k1, k2, k3, k4, k5, k6, kx = jax.random.split(key, 7)
    x = jax.random.normal(kx, (N, Cin, H, W), jnp.float32)
    w1 = jax.random.normal(k1, (Cout, Cin, 3, 3), jnp.float32) * (2.0 / (Cin * 9)) ** 0.5
    w2 = jax.random.normal(k2, (Cout, Cout, 3, 3), jnp.float32) * (2.0 / (Cout * 9)) ** 0.5
    g1 = 1.0 + 0.1 * jax.random.normal(k3, (Cout,), jnp.float32)
    b1 = 0.1 * jax.random.normal(k4, (Cout,), jnp.float32)
    g2 = 1.0 + 0.1 * jax.random.normal(k5, (Cout,), jnp.float32)
    b2 = 0.1 * jax.random.normal(k6, (Cout,), jnp.float32)

    out = encoder_block_forward(x, w1, g1, b1, w2, g2, b2, downsample=True)
    out = jax.block_until_ready(out)
    assert out.shape == (N, Cout, H // 2, W // 2), out.shape

    ref = _reference_forward(x, w1, g1, b1, w2, g2, b2)
    # bf16 matmul operands / bf16 inter-kernel activations (f32 accumulation)
    # => slightly looser tolerance than a pure-f32 pipeline.
    np.testing.assert_allclose(np.asarray(out), np.asarray(ref),
                               rtol=2e-2, atol=2e-2)
    print("KERNEL_OK")
</pallas_src>

<mosaic_0001>
module attributes {stable_mosaic.version = 11 : i64} {
  func.func @_affine_conv_stats_kernel(%arg0: i32, %arg1: memref<1x8x8x8xbf16, #tpu.memory_space<vmem>>, %arg2: memref<1x8xf32, #tpu.memory_space<vmem>>, %arg3: memref<1x8xf32, #tpu.memory_space<vmem>>, %arg4: memref<72x8xbf16, #tpu.memory_space<vmem>>, %arg5: memref<1x8x8x8xbf16, #tpu.memory_space<vmem>>, %arg6: memref<1x2x8xf32, #tpu.memory_space<vmem>>, %arg7: memref<10x10x8xf32, #tpu.memory_space<vmem>>, %arg8: memref<64x72xbf16, #tpu.memory_space<vmem>>) attributes {dimension_semantics = [#tpu.dimension_semantics<parallel>], iteration_bounds = array<i64: 2>, scalar_prefetch = 0 : i64, scratch_operands = 2 : i64, tpu.core_type = #tpu.core_type<tc>, window_params = [{transform_indices = @transform_0, window_bounds = array<i64: 1, 8, 8, 8>}, {pipeline_mode = #tpu.pipeline_mode<synchronous>, transform_indices = @transform_1, window_bounds = array<i64: 1, 8>}, {pipeline_mode = #tpu.pipeline_mode<synchronous>, transform_indices = @transform_2, window_bounds = array<i64: 1, 8>}, {pipeline_mode = #tpu.pipeline_mode<synchronous>, transform_indices = @transform_3, window_bounds = array<i64: 72, 8>}, {transform_indices = @transform_4, window_bounds = array<i64: 1, 8, 8, 8>}, {transform_indices = @transform_5, window_bounds = array<i64: 1, 2, 8>}]} {
    %c0 = arith.constant 0 : index
    %c0_0 = arith.constant 0 : index
    %c0_1 = arith.constant 0 : index
    %c0_2 = arith.constant 0 : index
    %0 = vector.load %arg1[%c0, %c0_0, %c0_1, %c0_2] : memref<1x8x8x8xbf16, #tpu.memory_space<vmem>>, vector<1x8x8x8xbf16>
    %1 = vector.shape_cast %0 : vector<1x8x8x8xbf16> to vector<8x8x8xbf16>
    %2 = arith.extf %1 : vector<8x8x8xbf16> to vector<8x8x8xf32>
    %c0_3 = arith.constant 0 : index
    %c0_4 = arith.constant 0 : index
    %3 = vector.load %arg2[%c0_3, %c0_4] : memref<1x8xf32, #tpu.memory_space<vmem>>, vector<1x8xf32>
    %4 = vector.shape_cast %3 : vector<1x8xf32> to vector<1x1x8xf32>
    %5 = vector.broadcast %4 : vector<1x1x8xf32> to vector<8x8x8xf32>
    %6 = arith.mulf %2, %5 : vector<8x8x8xf32>
    %c0_5 = arith.constant 0 : index
    %c0_6 = arith.constant 0 : index
    %7 = vector.load %arg3[%c0_5, %c0_6] : memref<1x8xf32, #tpu.memory_space<vmem>>, vector<1x8xf32>
    %8 = vector.shape_cast %7 : vector<1x8xf32> to vector<1x1x8xf32>
    %9 = vector.broadcast %8 : vector<1x1x8xf32> to vector<8x8x8xf32>
    %10 = arith.addf %6, %9 : vector<8x8x8xf32>
    %cst = arith.constant 0.000000e+00 : f32
    %11 = vector.broadcast %cst : f32 to vector<8x8x8xf32>
    %12 = arith.maximumf %10, %11 : vector<8x8x8xf32>
    %cst_7 = arith.constant 0.000000e+00 : f32
    %13 = vector.broadcast %cst_7 : f32 to vector<1x10x8xf32>
    %c0_8 = arith.constant 0 : index
    %c0_9 = arith.constant 0 : index
    %c0_10 = arith.constant 0 : index
    %14 = vector.load %arg7[%c0_8, %c0_9, %c0_10] : memref<10x10x8xf32, #tpu.memory_space<vmem>>, vector<1x10x8xf32>
    tpu.vector_store %arg7[%c0_8, %c0_9, %c0_10], %13 {strides = array<i32>} : memref<10x10x8xf32, #tpu.memory_space<vmem>>, vector<1x10x8xf32>,
    %c9 = arith.constant 9 : index
    %c0_11 = arith.constant 0 : index
    %c0_12 = arith.constant 0 : index
    %15 = vector.load %arg7[%c9, %c0_11, %c0_12] : memref<10x10x8xf32, #tpu.memory_space<vmem>>, vector<1x10x8xf32>
    tpu.vector_store %arg7[%c9, %c0_11, %c0_12], %13 {strides = array<i32>} : memref<10x10x8xf32, #tpu.memory_space<vmem>>, vector<1x10x8xf32>,
    %cst_13 = arith.constant 0.000000e+00 : f32
    %16 = vector.broadcast %cst_13 : f32 to vector<10x1x8xf32>
    %c0_14 = arith.constant 0 : index
    %c0_15 = arith.constant 0 : index
    %c0_16 = arith.constant 0 : index
    %17 = vector.load %arg7[%c0_14, %c0_15, %c0_16] : memref<10x10x8xf32, #tpu.memory_space<vmem>>, vector<10x1x8xf32>
    tpu.vector_store %arg7[%c0_14, %c0_15, %c0_16], %16 {strides = array<i32>} : memref<10x10x8xf32, #tpu.memory_space<vmem>>, vector<10x1x8xf32>,
    %c0_17 = arith.constant 0 : index
    %c9_18 = arith.constant 9 : index
    %c0_19 = arith.constant 0 : index
    %18 = vector.load %arg7[%c0_17, %c9_18, %c0_19] : memref<10x10x8xf32, #tpu.memory_space<vmem>>, vector<10x1x8xf32>
    tpu.vector_store %arg7[%c0_17, %c9_18, %c0_19], %16 {strides = array<i32>} : memref<10x10x8xf32, #tpu.memory_space<vmem>>, vector<10x1x8xf32>,
    %c1 = arith.constant 1 : index
    %c1_20 = arith.constant 1 : index
    %c0_21 = arith.constant 0 : index
    %19 = vector.load %arg7[%c1, %c1_20, %c0_21] : memref<10x10x8xf32, #tpu.memory_space<vmem>>, vector<8x8x8xf32>
    tpu.vector_store %arg7[%c1, %c1_20, %c0_21], %12 {strides = array<i32>} : memref<10x10x8xf32, #tpu.memory_space<vmem>>, vector<8x8x8xf32>,
    %c0_22 = arith.constant 0 : index
    %c0_23 = arith.constant 0 : index
    %c0_24 = arith.constant 0 : index
    %20 = vector.load %arg7[%c0_22, %c0_23, %c0_24] : memref<10x10x8xf32, #tpu.memory_space<vmem>>, vector<8x8x8xf32>
    %21 = vector.shape_cast %20 : vector<8x8x8xf32> to vector<64x8xf32>
    %22 = arith.truncf %21 : vector<64x8xf32> to vector<64x8xbf16>
    %c0_25 = arith.constant 0 : index
    %c0_26 = arith.constant 0 : index
    %23 = vector.load %arg8[%c0_25, %c0_26] : memref<64x72xbf16, #tpu.memory_space<vmem>>, vector<64x8xbf16>
    tpu.vector_store %arg8[%c0_25, %c0_26], %22 {strides = array<i32>} : memref<64x72xbf16, #tpu.memory_space<vmem>>, vector<64x8xbf16>,
    %c0_27 = arith.constant 0 : index
    %c1_28 = arith.constant 1 : index
    %c0_29 = arith.constant 0 : index
    %24 = vector.load %arg7[%c0_27, %c1_28, %c0_29] : memref<10x10x8xf32, #tpu.memory_space<vmem>>, vector<8x8x8xf32>
    %25 = vector.shape_cast %24 : vector<8x8x8xf32> to vector<64x8xf32>
    %26 = arith.truncf %25 : vector<64x8xf32> to vector<64x8xbf16>
    %c0_30 = arith.constant 0 : index
    %c8 = arith.constant 8 : index
    %27 = vector.load %arg8[%c0_30, %c8] : memref<64x72xbf16, #tpu.memory_space<vmem>>, vector<64x8xbf16>
    tpu.vector_store %arg8[%c0_30, %c8], %26 {strides = array<i32>} : memref<64x72xbf16, #tpu.memory_space<vmem>>, vector<64x8xbf16>,
    %c0_31 = arith.constant 0 : index
    %c2 = arith.constant 2 : index
    %c0_32 = arith.constant 0 : index
    %28 = vector.load %arg7[%c0_31, %c2, %c0_32] : memref<10x10x8xf32, #tpu.memory_space<vmem>>, vector<8x8x8xf32>
    %29 = vector.shape_cast %28 : vector<8x8x8xf32> to vector<64x8xf32>
    %30 = arith.truncf %29 : vector<64x8xf32> to vector<64x8xbf16>
    %c0_33 = arith.constant 0 : index
    %c16 = arith.constant 16 : index
    %31 = vector.load %arg8[%c0_33, %c16] : memref<64x72xbf16, #tpu.memory_space<vmem>>, vector<64x8xbf16>
    tpu.vector_store %arg8[%c0_33, %c16], %30 {strides = array<i32>} : memref<64x72xbf16, #tpu.memory_space<vmem>>, vector<64x8xbf16>,
    %c1_34 = arith.constant 1 : index
    %c0_35 = arith.constant 0 : index
    %c0_36 = arith.constant 0 : index
    %32 = vector.load %arg7[%c1_34, %c0_35, %c0_36] : memref<10x10x8xf32, #tpu.memory_space<vmem>>, vector<8x8x8xf32>
    %33 = vector.shape_cast %32 : vector<8x8x8xf32> to vector<64x8xf32>
    %34 = arith.truncf %33 : vector<64x8xf32> to vector<64x8xbf16>
    %c0_37 = arith.constant 0 : index
    %c24 = arith.constant 24 : index
    %35 = vector.load %arg8[%c0_37, %c24] : memref<64x72xbf16, #tpu.memory_space<vmem>>, vector<64x8xbf16>
    tpu.vector_store %arg8[%c0_37, %c24], %34 {strides = array<i32>} : memref<64x72xbf16, #tpu.memory_space<vmem>>, vector<64x8xbf16>,
    %c1_38 = arith.constant 1 : index
    %c1_39 = arith.constant 1 : index
    %c0_40 = arith.constant 0 : index
    %36 = vector.load %arg7[%c1_38, %c1_39, %c0_40] : memref<10x10x8xf32, #tpu.memory_space<vmem>>, vector<8x8x8xf32>
    %37 = vector.shape_cast %36 : vector<8x8x8xf32> to vector<64x8xf32>
    %38 = arith.truncf %37 : vector<64x8xf32> to vector<64x8xbf16>
    %c0_41 = arith.constant 0 : index
    %c32 = arith.constant 32 : index
    %39 = vector.load %arg8[%c0_41, %c32] : memref<64x72xbf16, #tpu.memory_space<vmem>>, vector<64x8xbf16>
    tpu.vector_store %arg8[%c0_41, %c32], %38 {strides = array<i32>} : memref<64x72xbf16, #tpu.memory_space<vmem>>, vector<64x8xbf16>,
    %c1_42 = arith.constant 1 : index
    %c2_43 = arith.constant 2 : index
    %c0_44 = arith.constant 0 : index
    %40 = vector.load %arg7[%c1_42, %c2_43, %c0_44] : memref<10x10x8xf32, #tpu.memory_space<vmem>>, vector<8x8x8xf32>
    %41 = vector.shape_cast %40 : vector<8x8x8xf32> to vector<64x8xf32>
    %42 = arith.truncf %41 : vector<64x8xf32> to vector<64x8xbf16>
    %c0_45 = arith.constant 0 : index
    %c40 = arith.constant 40 : index
    %43 = vector.load %arg8[%c0_45, %c40] : memref<64x72xbf16, #tpu.memory_space<vmem>>, vector<64x8xbf16>
    tpu.vector_store %arg8[%c0_45, %c40], %42 {strides = array<i32>} : memref<64x72xbf16, #tpu.memory_space<vmem>>, vector<64x8xbf16>,
    %c2_46 = arith.constant 2 : index
    %c0_47 = arith.constant 0 : index
    %c0_48 = arith.constant 0 : index
    %44 = vector.load %arg7[%c2_46, %c0_47, %c0_48] : memref<10x10x8xf32, #tpu.memory_space<vmem>>, vector<8x8x8xf32>
    %45 = vector.shape_cast %44 : vector<8x8x8xf32> to vector<64x8xf32>
    %46 = arith.truncf %45 : vector<64x8xf32> to vector<64x8xbf16>
    %c0_49 = arith.constant 0 : index
    %c48 = arith.constant 48 : index
    %47 = vector.load %arg8[%c0_49, %c48] : memref<64x72xbf16, #tpu.memory_space<vmem>>, vector<64x8xbf16>
    tpu.vector_store %arg8[%c0_49, %c48], %46 {strides = array<i32>} : memref<64x72xbf16, #tpu.memory_space<vmem>>, vector<64x8xbf16>,
    %c2_50 = arith.constant 2 : index
    %c1_51 = arith.constant 1 : index
    %c0_52 = arith.constant 0 : index
    %48 = vector.load %arg7[%c2_50, %c1_51, %c0_52] : memref<10x10x8xf32, #tpu.memory_space<vmem>>, vector<8x8x8xf32>
    %49 = vector.shape_cast %48 : vector<8x8x8xf32> to vector<64x8xf32>
    %50 = arith.truncf %49 : vector<64x8xf32> to vector<64x8xbf16>
    %c0_53 = arith.constant 0 : index
    %c56 = arith.constant 56 : index
    %51 = vector.load %arg8[%c0_53, %c56] : memref<64x72xbf16, #tpu.memory_space<vmem>>, vector<64x8xbf16>
    tpu.vector_store %arg8[%c0_53, %c56], %50 {strides = array<i32>} : memref<64x72xbf16, #tpu.memory_space<vmem>>, vector<64x8xbf16>,
    %c2_54 = arith.constant 2 : index
    %c2_55 = arith.constant 2 : index
    %c0_56 = arith.constant 0 : index
    %52 = vector.load %arg7[%c2_54, %c2_55, %c0_56] : memref<10x10x8xf32, #tpu.memory_space<vmem>>, vector<8x8x8xf32>
    %53 = vector.shape_cast %52 : vector<8x8x8xf32> to vector<64x8xf32>
    %54 = arith.truncf %53 : vector<64x8xf32> to vector<64x8xbf16>
    %c0_57 = arith.constant 0 : index
    %c64 = arith.constant 64 : index
    %55 = vector.load %arg8[%c0_57, %c64] : memref<64x72xbf16, #tpu.memory_space<vmem>>, vector<64x8xbf16>
    tpu.vector_store %arg8[%c0_57, %c64], %54 {strides = array<i32>} : memref<64x72xbf16, #tpu.memory_space<vmem>>, vector<64x8xbf16>,
    %c0_58 = arith.constant 0 : index
    %c0_59 = arith.constant 0 : index
    %56 = vector.load %arg8[%c0_58, %c0_59] : memref<64x72xbf16, #tpu.memory_space<vmem>>, vector<64x72xbf16>
    %c0_60 = arith.constant 0 : index
    %c0_61 = arith.constant 0 : index
    %57 = vector.load %arg4[%c0_60, %c0_61] : memref<72x8xbf16, #tpu.memory_space<vmem>>, vector<72x8xbf16>
    %cst_62 = arith.constant dense<0.000000e+00> : vector<64x8xf32>
    %58 = tpu.matmul %56, %57, %cst_62 {dimension_numbers = #tpu.dot_dimension_numbers<[1], [0], [0], [1], [0, 0, 1, 1], [], []>} : vector<64x72xbf16>, vector<72x8xbf16>, vector<64x8xf32> -> vector<64x8xf32>
    %59 = vector.shape_cast %58 : vector<64x8xf32> to vector<8x8x8xf32>
    %60 = arith.truncf %59 : vector<8x8x8xf32> to vector<8x8x8xbf16>
    %c0_63 = arith.constant 0 : index
    %c0_64 = arith.constant 0 : index
    %c0_65 = arith.constant 0 : index
    %c0_66 = arith.constant 0 : index
    %61 = vector.load %arg5[%c0_63, %c0_64, %c0_65, %c0_66] : memref<1x8x8x8xbf16, #tpu.memory_space<vmem>>, vector<1x8x8x8xbf16>
    %62 = vector.shape_cast %61 : vector<1x8x8x8xbf16> to vector<8x8x8xbf16>
    %63 = vector.shape_cast %60 : vector<8x8x8xbf16> to vector<1x8x8x8xbf16>
    tpu.vector_store %arg5[%c0_63, %c0_64, %c0_65, %c0_66], %63 {strides = array<i32>} : memref<1x8x8x8xbf16, #tpu.memory_space<vmem>>, vector<1x8x8x8xbf16>,
    %cst_67 = arith.constant dense<0.000000e+00> : vector<8xf32>
    %64 = vector.multi_reduction <add>, %58, %cst_67 [0] : vector<64x8xf32> to vector<8xf32>
    %65 = vector.shape_cast %64 : vector<8xf32> to vector<1x8xf32>
    %66 = arith.mulf %58, %58 : vector<64x8xf32>
    %cst_68 = arith.constant dense<0.000000e+00> : vector<8xf32>
    %67 = vector.multi_reduction <add>, %66, %cst_68 [0] : vector<64x8xf32> to vector<8xf32>
    %68 = vector.shape_cast %67 : vector<8xf32> to vector<1x8xf32>
    %69 = tpu.concatenate %65, %68 in 0 : vector<1x8xf32>, vector<1x8xf32> -> vector<2x8xf32>
    %c0_69 = arith.constant 0 : index
    %c0_70 = arith.constant 0 : index
    %c0_71 = arith.constant 0 : index
    %70 = vector.load %arg6[%c0_69, %c0_70, %c0_71] : memref<1x2x8xf32, #tpu.memory_space<vmem>>, vector<1x2x8xf32>
    %71 = vector.shape_cast %70 : vector<1x2x8xf32> to vector<2x8xf32>
    %72 = vector.shape_cast %69 : vector<2x8xf32> to vector<1x2x8xf32>
    tpu.vector_store %arg6[%c0_69, %c0_70, %c0_71], %72 {strides = array<i32>} : memref<1x2x8xf32, #tpu.memory_space<vmem>>, vector<1x2x8xf32>,
    return
  }
  func.func @transform_0(%arg0: i32) -> (i32, i32, i32, i32) {
    %c0_i32 = arith.constant 0 : i32
    %c0_i32_0 = arith.constant 0 : i32
    %c0_i32_1 = arith.constant 0 : i32
    %c0_i32_2 = arith.constant 0 : i32
    return %arg0, %c0_i32, %c0_i32_0, %c0_i32_1 : i32, i32, i32, i32
  }
  func.func @transform_1(%arg0: i32) -> (i32, i32) {
    %c0_i32 = arith.constant 0 : i32
    %c0_i32_0 = arith.constant 0 : i32
    %c0_i32_1 = arith.constant 0 : i32
    return %c0_i32, %c0_i32_0 : i32, i32
  }
  func.func @transform_2(%arg0: i32) -> (i32, i32) {
    %c0_i32 = arith.constant 0 : i32
    %c0_i32_0 = arith.constant 0 : i32
    %c0_i32_1 = arith.constant 0 : i32
    return %c0_i32, %c0_i32_0 : i32, i32
  }
  func.func @transform_3(%arg0: i32) -> (i32, i32) {
    %c0_i32 = arith.constant 0 : i32
    %c0_i32_0 = arith.constant 0 : i32
    %c0_i32_1 = arith.constant 0 : i32
    return %c0_i32, %c0_i32_0 : i32, i32
  }
  func.func @transform_4(%arg0: i32) -> (i32, i32, i32, i32) {
    %c0_i32 = arith.constant 0 : i32
    %c0_i32_0 = arith.constant 0 : i32
    %c0_i32_1 = arith.constant 0 : i32
    %c0_i32_2 = arith.constant 0 : i32
    return %arg0, %c0_i32, %c0_i32_0, %c0_i32_1 : i32, i32, i32, i32
  }
  func.func @transform_5(%arg0: i32) -> (i32, i32, i32) {
    %c0_i32 = arith.constant 0 : i32
    %c0_i32_0 = arith.constant 0 : i32
    %c0_i32_1 = arith.constant 0 : i32
    return %arg0, %c0_i32, %c0_i32_0 : i32, i32, i32
  }
}

module attributes {stable_mosaic.version = 11 : i64} {
  func.func @_pool_conv_stats_kernel(%arg0: i32, %arg1: memref<1x16x16x4xbf16, #tpu.memory_space<vmem>>, %arg2: memref<36x8xbf16, #tpu.memory_space<vmem>>, %arg3: memref<1x8x8x8xbf16, #tpu.memory_space<vmem>>, %arg4: memref<1x2x8xf32, #tpu.memory_space<vmem>>, %arg5: memref<17x17x4xf32, #tpu.memory_space<vmem>>, %arg6: memref<10x10x4xf32, #tpu.memory_space<vmem>>, %arg7: memref<64x36xbf16, #tpu.memory_space<vmem>>) attributes {dimension_semantics = [#tpu.dimension_semantics<parallel>], iteration_bounds = array<i64: 2>, scalar_prefetch = 0 : i64, scratch_operands = 3 : i64, tpu.core_type = #tpu.core_type<tc>, window_params = [{transform_indices = @transform_0, window_bounds = array<i64: 1, 16, 16, 4>}, {pipeline_mode = #tpu.pipeline_mode<synchronous>, transform_indices = @transform_1, window_bounds = array<i64: 36, 8>}, {transform_indices = @transform_2, window_bounds = array<i64: 1, 8, 8, 8>}, {transform_indices = @transform_3, window_bounds = array<i64: 1, 2, 8>}]} {
    %cst = arith.constant 0xFF800000 : f32
    %0 = vector.broadcast %cst : f32 to vector<1x17x4xf32>
    %c0 = arith.constant 0 : index
    %c0_0 = arith.constant 0 : index
    %c0_1 = arith.constant 0 : index
    %1 = vector.load %arg5[%c0, %c0_0, %c0_1] : memref<17x17x4xf32, #tpu.memory_space<vmem>>, vector<1x17x4xf32>
    tpu.vector_store %arg5[%c0, %c0_0, %c0_1], %0 {strides = array<i32>} : memref<17x17x4xf32, #tpu.memory_space<vmem>>, vector<1x17x4xf32>,
    %cst_2 = arith.constant 0xFF800000 : f32
    %2 = vector.broadcast %cst_2 : f32 to vector<17x1x4xf32>
    %c0_3 = arith.constant 0 : index
    %c0_4 = arith.constant 0 : index
    %c0_5 = arith.constant 0 : index
    %3 = vector.load %arg5[%c0_3, %c0_4, %c0_5] : memref<17x17x4xf32, #tpu.memory_space<vmem>>, vector<17x1x4xf32>
    tpu.vector_store %arg5[%c0_3, %c0_4, %c0_5], %2 {strides = array<i32>} : memref<17x17x4xf32, #tpu.memory_space<vmem>>, vector<17x1x4xf32>,
    %c0_6 = arith.constant 0 : index
    %c0_7 = arith.constant 0 : index
    %c0_8 = arith.constant 0 : index
    %c0_9 = arith.constant 0 : index
    %4 = vector.load %arg1[%c0_6, %c0_7, %c0_8, %c0_9] : memref<1x16x16x4xbf16, #tpu.memory_space<vmem>>, vector<1x16x16x4xbf16>
    %5 = vector.shape_cast %4 : vector<1x16x16x4xbf16> to vector<16x16x4xbf16>
    %6 = arith.extf %5 : vector<16x16x4xbf16> to vector<16x16x4xf32>
    %c1 = arith.constant 1 : index
    %c1_10 = arith.constant 1 : index
    %c0_11 = arith.constant 0 : index
    %7 = vector.load %arg5[%c1, %c1_10, %c0_11] : memref<17x17x4xf32, #tpu.memory_space<vmem>>, vector<16x16x4xf32>
    tpu.vector_store %arg5[%c1, %c1_10, %c0_11], %6 {strides = array<i32>} : memref<17x17x4xf32, #tpu.memory_space<vmem>>, vector<16x16x4xf32>,
    %c0_12 = arith.constant 0 : index
    %c0_13 = arith.constant 0 : index
    %c0_14 = arith.constant 0 : index
    %8 = tpu.strided_load %arg5[%c0_12, %c0_13, %c0_14] {strides = array<i32: 2, 2, 1>} : memref<17x17x4xf32, #tpu.memory_space<vmem>>, vector<8x8x4xf32>
    %c0_15 = arith.constant 0 : index
    %c1_16 = arith.constant 1 : index
    %c0_17 = arith.constant 0 : index
    %9 = tpu.strided_load %arg5[%c0_15, %c1_16, %c0_17] {strides = array<i32: 2, 2, 1>} : memref<17x17x4xf32, #tpu.memory_space<vmem>>, vector<8x8x4xf32>
    %10 = arith.maximumf %8, %9 : vector<8x8x4xf32>
    %c0_18 = arith.constant 0 : index
    %c2 = arith.constant 2 : index
    %c0_19 = arith.constant 0 : index
    %11 = tpu.strided_load %arg5[%c0_18, %c2, %c0_19] {strides = array<i32: 2, 2, 1>} : memref<17x17x4xf32, #tpu.memory_space<vmem>>, vector<8x8x4xf32>
    %12 = arith.maximumf %10, %11 : vector<8x8x4xf32>
    %c1_20 = arith.constant 1 : index
    %c0_21 = arith.constant 0 : index
    %c0_22 = arith.constant 0 : index
    %13 = tpu.strided_load %arg5[%c1_20, %c0_21, %c0_22] {strides = array<i32: 2, 2, 1>} : memref<17x17x4xf32, #tpu.memory_space<vmem>>, vector<8x8x4xf32>
    %14 = arith.maximumf %12, %13 : vector<8x8x4xf32>
    %c1_23 = arith.constant 1 : index
    %c1_24 = arith.constant 1 : index
    %c0_25 = arith.constant 0 : index
    %15 = tpu.strided_load %arg5[%c1_23, %c1_24, %c0_25] {strides = array<i32: 2, 2, 1>} : memref<17x17x4xf32, #tpu.memory_space<vmem>>, vector<8x8x4xf32>
    %16 = arith.maximumf %14, %15 : vector<8x8x4xf32>
    %c1_26 = arith.constant 1 : index
    %c2_27 = arith.constant 2 : index
    %c0_28 = arith.constant 0 : index
    %17 = tpu.strided_load %arg5[%c1_26, %c2_27, %c0_28] {strides = array<i32: 2, 2, 1>} : memref<17x17x4xf32, #tpu.memory_space<vmem>>, vector<8x8x4xf32>
    %18 = arith.maximumf %16, %17 : vector<8x8x4xf32>
    %c2_29 = arith.constant 2 : index
    %c0_30 = arith.constant 0 : index
    %c0_31 = arith.constant 0 : index
    %19 = tpu.strided_load %arg5[%c2_29, %c0_30, %c0_31] {strides = array<i32: 2, 2, 1>} : memref<17x17x4xf32, #tpu.memory_space<vmem>>, vector<8x8x4xf32>
    %20 = arith.maximumf %18, %19 : vector<8x8x4xf32>
    %c2_32 = arith.constant 2 : index
    %c1_33 = arith.constant 1 : index
    %c0_34 = arith.constant 0 : index
    %21 = tpu.strided_load %arg5[%c2_32, %c1_33, %c0_34] {strides = array<i32: 2, 2, 1>} : memref<17x17x4xf32, #tpu.memory_space<vmem>>, vector<8x8x4xf32>
    %22 = arith.maximumf %20, %21 : vector<8x8x4xf32>
    %c2_35 = arith.constant 2 : index
    %c2_36 = arith.constant 2 : index
    %c0_37 = arith.constant 0 : index
    %23 = tpu.strided_load %arg5[%c2_35, %c2_36, %c0_37] {strides = array<i32: 2, 2, 1>} : memref<17x17x4xf32, #tpu.memory_space<vmem>>, vector<8x8x4xf32>
    %24 = arith.maximumf %22, %23 : vector<8x8x4xf32>
    %cst_38 = arith.constant 0.000000e+00 : f32
    %25 = vector.broadcast %cst_38 : f32 to vector<1x10x4xf32>
    %c0_39 = arith.constant 0 : index
    %c0_40 = arith.constant 0 : index
    %c0_41 = arith.constant 0 : index
    %26 = vector.load %arg6[%c0_39, %c0_40, %c0_41] : memref<10x10x4xf32, #tpu.memory_space<vmem>>, vector<1x10x4xf32>
    tpu.vector_store %arg6[%c0_39, %c0_40, %c0_41], %25 {strides = array<i32>} : memref<10x10x4xf32, #tpu.memory_space<vmem>>, vector<1x10x4xf32>,
    %c9 = arith.constant 9 : index
    %c0_42 = arith.constant 0 : index
    %c0_43 = arith.constant 0 : index
    %27 = vector.load %arg6[%c9, %c0_42, %c0_43] : memref<10x10x4xf32, #tpu.memory_space<vmem>>, vector<1x10x4xf32>
    tpu.vector_store %arg6[%c9, %c0_42, %c0_43], %25 {strides = array<i32>} : memref<10x10x4xf32, #tpu.memory_space<vmem>>, vector<1x10x4xf32>,
    %cst_44 = arith.constant 0.000000e+00 : f32
    %28 = vector.broadcast %cst_44 : f32 to vector<10x1x4xf32>
    %c0_45 = arith.constant 0 : index
    %c0_46 = arith.constant 0 : index
    %c0_47 = arith.constant 0 : index
    %29 = vector.load %arg6[%c0_45, %c0_46, %c0_47] : memref<10x10x4xf32, #tpu.memory_space<vmem>>, vector<10x1x4xf32>
    tpu.vector_store %arg6[%c0_45, %c0_46, %c0_47], %28 {strides = array<i32>} : memref<10x10x4xf32, #tpu.memory_space<vmem>>, vector<10x1x4xf32>,
    %c0_48 = arith.constant 0 : index
    %c9_49 = arith.constant 9 : index
    %c0_50 = arith.constant 0 : index
    %30 = vector.load %arg6[%c0_48, %c9_49, %c0_50] : memref<10x10x4xf32, #tpu.memory_space<vmem>>, vector<10x1x4xf32>
    tpu.vector_store %arg6[%c0_48, %c9_49, %c0_50], %28 {strides = array<i32>} : memref<10x10x4xf32, #tpu.memory_space<vmem>>, vector<10x1x4xf32>,
    %c1_51 = arith.constant 1 : index
    %c1_52 = arith.constant 1 : index
    %c0_53 = arith.constant 0 : index
    %31 = vector.load %arg6[%c1_51, %c1_52, %c0_53] : memref<10x10x4xf32, #tpu.memory_space<vmem>>, vector<8x8x4xf32>
    tpu.vector_store %arg6[%c1_51, %c1_52, %c0_53], %24 {strides = array<i32>} : memref<10x10x4xf32, #tpu.memory_space<vmem>>, vector<8x8x4xf32>,
    %c0_54 = arith.constant 0 : index
    %c0_55 = arith.constant 0 : index
    %c0_56 = arith.constant 0 : index
    %32 = vector.load %arg6[%c0_54, %c0_55, %c0_56] : memref<10x10x4xf32, #tpu.memory_space<vmem>>, vector<8x8x4xf32>
    %33 = vector.shape_cast %32 : vector<8x8x4xf32> to vector<64x4xf32>
    %34 = arith.truncf %33 : vector<64x4xf32> to vector<64x4xbf16>
    %c0_57 = arith.constant 0 : index
    %c0_58 = arith.constant 0 : index
    %35 = vector.load %arg7[%c0_57, %c0_58] : memref<64x36xbf16, #tpu.memory_space<vmem>>, vector<64x4xbf16>
    tpu.vector_store %arg7[%c0_57, %c0_58], %34 {strides = array<i32>} : memref<64x36xbf16, #tpu.memory_space<vmem>>, vector<64x4xbf16>,
    %c0_59 = arith.constant 0 : index
    %c1_60 = arith.constant 1 : index
    %c0_61 = arith.constant 0 : index
    %36 = vector.load %arg6[%c0_59, %c1_60, %c0_61] : memref<10x10x4xf32, #tpu.memory_space<vmem>>, vector<8x8x4xf32>
    %37 = vector.shape_cast %36 : vector<8x8x4xf32> to vector<64x4xf32>
    %38 = arith.truncf %37 : vector<64x4xf32> to vector<64x4xbf16>
    %c0_62 = arith.constant 0 : index
    %c4 = arith.constant 4 : index
    %39 = vector.load %arg7[%c0_62, %c4] : memref<64x36xbf16, #tpu.memory_space<vmem>>, vector<64x4xbf16>
    tpu.vector_store %arg7[%c0_62, %c4], %38 {strides = array<i32>} : memref<64x36xbf16, #tpu.memory_space<vmem>>, vector<64x4xbf16>,
    %c0_63 = arith.constant 0 : index
    %c2_64 = arith.constant 2 : index
    %c0_65 = arith.constant 0 : index
    %40 = vector.load %arg6[%c0_63, %c2_64, %c0_65] : memref<10x10x4xf32, #tpu.memory_space<vmem>>, vector<8x8x4xf32>
    %41 = vector.shape_cast %40 : vector<8x8x4xf32> to vector<64x4xf32>
    %42 = arith.truncf %41 : vector<64x4xf32> to vector<64x4xbf16>
    %c0_66 = arith.constant 0 : index
    %c8 = arith.constant 8 : index
    %43 = vector.load %arg7[%c0_66, %c8] : memref<64x36xbf16, #tpu.memory_space<vmem>>, vector<64x4xbf16>
    tpu.vector_store %arg7[%c0_66, %c8], %42 {strides = array<i32>} : memref<64x36xbf16, #tpu.memory_space<vmem>>, vector<64x4xbf16>,
    %c1_67 = arith.constant 1 : index
    %c0_68 = arith.constant 0 : index
    %c0_69 = arith.constant 0 : index
    %44 = vector.load %arg6[%c1_67, %c0_68, %c0_69] : memref<10x10x4xf32, #tpu.memory_space<vmem>>, vector<8x8x4xf32>
    %45 = vector.shape_cast %44 : vector<8x8x4xf32> to vector<64x4xf32>
    %46 = arith.truncf %45 : vector<64x4xf32> to vector<64x4xbf16>
    %c0_70 = arith.constant 0 : index
    %c12 = arith.constant 12 : index
    %47 = vector.load %arg7[%c0_70, %c12] : memref<64x36xbf16, #tpu.memory_space<vmem>>, vector<64x4xbf16>
    tpu.vector_store %arg7[%c0_70, %c12], %46 {strides = array<i32>} : memref<64x36xbf16, #tpu.memory_space<vmem>>, vector<64x4xbf16>,
    %c1_71 = arith.constant 1 : index
    %c1_72 = arith.constant 1 : index
    %c0_73 = arith.constant 0 : index
    %48 = vector.load %arg6[%c1_71, %c1_72, %c0_73] : memref<10x10x4xf32, #tpu.memory_space<vmem>>, vector<8x8x4xf32>
    %49 = vector.shape_cast %48 : vector<8x8x4xf32> to vector<64x4xf32>
    %50 = arith.truncf %49 : vector<64x4xf32> to vector<64x4xbf16>
    %c0_74 = arith.constant 0 : index
    %c16 = arith.constant 16 : index
    %51 = vector.load %arg7[%c0_74, %c16] : memref<64x36xbf16, #tpu.memory_space<vmem>>, vector<64x4xbf16>
    tpu.vector_store %arg7[%c0_74, %c16], %50 {strides = array<i32>} : memref<64x36xbf16, #tpu.memory_space<vmem>>, vector<64x4xbf16>,
    %c1_75 = arith.constant 1 : index
    %c2_76 = arith.constant 2 : index
    %c0_77 = arith.constant 0 : index
    %52 = vector.load %arg6[%c1_75, %c2_76, %c0_77] : memref<10x10x4xf32, #tpu.memory_space<vmem>>, vector<8x8x4xf32>
    %53 = vector.shape_cast %52 : vector<8x8x4xf32> to vector<64x4xf32>
    %54 = arith.truncf %53 : vector<64x4xf32> to vector<64x4xbf16>
    %c0_78 = arith.constant 0 : index
    %c20 = arith.constant 20 : index
    %55 = vector.load %arg7[%c0_78, %c20] : memref<64x36xbf16, #tpu.memory_space<vmem>>, vector<64x4xbf16>
    tpu.vector_store %arg7[%c0_78, %c20], %54 {strides = array<i32>} : memref<64x36xbf16, #tpu.memory_space<vmem>>, vector<64x4xbf16>,
    %c2_79 = arith.constant 2 : index
    %c0_80 = arith.constant 0 : index
    %c0_81 = arith.constant 0 : index
    %56 = vector.load %arg6[%c2_79, %c0_80, %c0_81] : memref<10x10x4xf32, #tpu.memory_space<vmem>>, vector<8x8x4xf32>
    %57 = vector.shape_cast %56 : vector<8x8x4xf32> to vector<64x4xf32>
    %58 = arith.truncf %57 : vector<64x4xf32> to vector<64x4xbf16>
    %c0_82 = arith.constant 0 : index
    %c24 = arith.constant 24 : index
    %59 = vector.load %arg7[%c0_82, %c24] : memref<64x36xbf16, #tpu.memory_space<vmem>>, vector<64x4xbf16>
    tpu.vector_store %arg7[%c0_82, %c24], %58 {strides = array<i32>} : memref<64x36xbf16, #tpu.memory_space<vmem>>, vector<64x4xbf16>,
    %c2_83 = arith.constant 2 : index
    %c1_84 = arith.constant 1 : index
    %c0_85 = arith.constant 0 : index
    %60 = vector.load %arg6[%c2_83, %c1_84, %c0_85] : memref<10x10x4xf32, #tpu.memory_space<vmem>>, vector<8x8x4xf32>
    %61 = vector.shape_cast %60 : vector<8x8x4xf32> to vector<64x4xf32>
    %62 = arith.truncf %61 : vector<64x4xf32> to vector<64x4xbf16>
    %c0_86 = arith.constant 0 : index
    %c28 = arith.constant 28 : index
    %63 = vector.load %arg7[%c0_86, %c28] : memref<64x36xbf16, #tpu.memory_space<vmem>>, vector<64x4xbf16>
    tpu.vector_store %arg7[%c0_86, %c28], %62 {strides = array<i32>} : memref<64x36xbf16, #tpu.memory_space<vmem>>, vector<64x4xbf16>,
    %c2_87 = arith.constant 2 : index
    %c2_88 = arith.constant 2 : index
    %c0_89 = arith.constant 0 : index
    %64 = vector.load %arg6[%c2_87, %c2_88, %c0_89] : memref<10x10x4xf32, #tpu.memory_space<vmem>>, vector<8x8x4xf32>
    %65 = vector.shape_cast %64 : vector<8x8x4xf32> to vector<64x4xf32>
    %66 = arith.truncf %65 : vector<64x4xf32> to vector<64x4xbf16>
    %c0_90 = arith.constant 0 : index
    %c32 = arith.constant 32 : index
    %67 = vector.load %arg7[%c0_90, %c32] : memref<64x36xbf16, #tpu.memory_space<vmem>>, vector<64x4xbf16>
    tpu.vector_store %arg7[%c0_90, %c32], %66 {strides = array<i32>} : memref<64x36xbf16, #tpu.memory_space<vmem>>, vector<64x4xbf16>,
    %c0_91 = arith.constant 0 : index
    %c0_92 = arith.constant 0 : index
    %68 = vector.load %arg7[%c0_91, %c0_92] : memref<64x36xbf16, #tpu.memory_space<vmem>>, vector<64x36xbf16>
    %c0_93 = arith.constant 0 : index
    %c0_94 = arith.constant 0 : index
    %69 = vector.load %arg2[%c0_93, %c0_94] : memref<36x8xbf16, #tpu.memory_space<vmem>>, vector<36x8xbf16>
    %cst_95 = arith.constant dense<0.000000e+00> : vector<64x8xf32>
    %70 = tpu.matmul %68, %69, %cst_95 {dimension_numbers = #tpu.dot_dimension_numbers<[1], [0], [0], [1], [0, 0, 1, 1], [], []>} : vector<64x36xbf16>, vector<36x8xbf16>, vector<64x8xf32> -> vector<64x8xf32>
    %71 = vector.shape_cast %70 : vector<64x8xf32> to vector<8x8x8xf32>
    %72 = arith.truncf %71 : vector<8x8x8xf32> to vector<8x8x8xbf16>
    %c0_96 = arith.constant 0 : index
    %c0_97 = arith.constant 0 : index
    %c0_98 = arith.constant 0 : index
    %c0_99 = arith.constant 0 : index
    %73 = vector.load %arg3[%c0_96, %c0_97, %c0_98, %c0_99] : memref<1x8x8x8xbf16, #tpu.memory_space<vmem>>, vector<1x8x8x8xbf16>
    %74 = vector.shape_cast %73 : vector<1x8x8x8xbf16> to vector<8x8x8xbf16>
    %75 = vector.shape_cast %72 : vector<8x8x8xbf16> to vector<1x8x8x8xbf16>
    tpu.vector_store %arg3[%c0_96, %c0_97, %c0_98, %c0_99], %75 {strides = array<i32>} : memref<1x8x8x8xbf16, #tpu.memory_space<vmem>>, vector<1x8x8x8xbf16>,
    %cst_100 = arith.constant dense<0.000000e+00> : vector<8xf32>
    %76 = vector.multi_reduction <add>, %70, %cst_100 [0] : vector<64x8xf32> to vector<8xf32>
    %77 = vector.shape_cast %76 : vector<8xf32> to vector<1x8xf32>
    %78 = arith.mulf %70, %70 : vector<64x8xf32>
    %cst_101 = arith.constant dense<0.000000e+00> : vector<8xf32>
    %79 = vector.multi_reduction <add>, %78, %cst_101 [0] : vector<64x8xf32> to vector<8xf32>
    %80 = vector.shape_cast %79 : vector<8xf32> to vector<1x8xf32>
    %81 = tpu.concatenate %77, %80 in 0 : vector<1x8xf32>, vector<1x8xf32> -> vector<2x8xf32>
    %c0_102 = arith.constant 0 : index
    %c0_103 = arith.constant 0 : index
    %c0_104 = arith.constant 0 : index
    %82 = vector.load %arg4[%c0_102, %c0_103, %c0_104] : memref<1x2x8xf32, #tpu.memory_space<vmem>>, vector<1x2x8xf32>
    %83 = vector.shape_cast %82 : vector<1x2x8xf32> to vector<2x8xf32>
    %84 = vector.shape_cast %81 : vector<2x8xf32> to vector<1x2x8xf32>
    tpu.vector_store %arg4[%c0_102, %c0_103, %c0_104], %84 {strides = array<i32>} : memref<1x2x8xf32, #tpu.memory_space<vmem>>, vector<1x2x8xf32>,
    return
  }
  func.func @transform_0(%arg0: i32) -> (i32, i32, i32, i32) {
    %c0_i32 = arith.constant 0 : i32
    %c0_i32_0 = arith.constant 0 : i32
    %c0_i32_1 = arith.constant 0 : i32
    %c0_i32_2 = arith.constant 0 : i32
    return %arg0, %c0_i32, %c0_i32_0, %c0_i32_1 : i32, i32, i32, i32
  }
  func.func @transform_1(%arg0: i32) -> (i32, i32) {
    %c0_i32 = arith.constant 0 : i32
    %c0_i32_0 = arith.constant 0 : i32
    %c0_i32_1 = arith.constant 0 : i32
    return %c0_i32, %c0_i32_0 : i32, i32
  }
  func.func @transform_2(%arg0: i32) -> (i32, i32, i32, i32) {
    %c0_i32 = arith.constant 0 : i32
    %c0_i32_0 = arith.constant 0 : i32
    %c0_i32_1 = arith.constant 0 : i32
    %c0_i32_2 = arith.constant 0 : i32
    return %arg0, %c0_i32, %c0_i32_0, %c0_i32_1 : i32, i32, i32, i32
  }
  func.func @transform_3(%arg0: i32) -> (i32, i32, i32) {
    %c0_i32 = arith.constant 0 : i32
    %c0_i32_0 = arith.constant 0 : i32
    %c0_i32_1 = arith.constant 0 : i32
    return %arg0, %c0_i32, %c0_i32_0 : i32, i32, i32
  }
}

module attributes {stable_mosaic.version = 11 : i64} {
  func.func @_affine_relu_kernel(%arg0: i32, %arg1: memref<16x64xbf16, #tpu.memory_space<vmem>>, %arg2: memref<1x64xf32, #tpu.memory_space<vmem>>, %arg3: memref<1x64xf32, #tpu.memory_space<vmem>>, %arg4: memref<16x64xf32, #tpu.memory_space<vmem>>) attributes {dimension_semantics = [#tpu.dimension_semantics<parallel>], iteration_bounds = array<i64: 1>, scalar_prefetch = 0 : i64, scratch_operands = 0 : i64, tpu.core_type = #tpu.core_type<tc>, window_params = [{transform_indices = @transform_0, window_bounds = array<i64: 16, 64>}, {pipeline_mode = #tpu.pipeline_mode<synchronous>, transform_indices = @transform_1, window_bounds = array<i64: 1, 64>}, {pipeline_mode = #tpu.pipeline_mode<synchronous>, transform_indices = @transform_2, window_bounds = array<i64: 1, 64>}, {transform_indices = @transform_3, window_bounds = array<i64: 16, 64>}]} {
    %c0 = arith.constant 0 : index
    %c0_0 = arith.constant 0 : index
    %0 = vector.load %arg1[%c0, %c0_0] : memref<16x64xbf16, #tpu.memory_space<vmem>>, vector<16x64xbf16>
    %1 = arith.extf %0 : vector<16x64xbf16> to vector<16x64xf32>
    %c0_1 = arith.constant 0 : index
    %c0_2 = arith.constant 0 : index
    %2 = vector.load %arg2[%c0_1, %c0_2] : memref<1x64xf32, #tpu.memory_space<vmem>>, vector<1x64xf32>
    %3 = vector.broadcast %2 : vector<1x64xf32> to vector<16x64xf32>
    %4 = arith.mulf %1, %3 : vector<16x64xf32>
    %c0_3 = arith.constant 0 : index
    %c0_4 = arith.constant 0 : index
    %5 = vector.load %arg3[%c0_3, %c0_4] : memref<1x64xf32, #tpu.memory_space<vmem>>, vector<1x64xf32>
    %6 = vector.broadcast %5 : vector<1x64xf32> to vector<16x64xf32>
    %7 = arith.addf %4, %6 : vector<16x64xf32>
    %cst = arith.constant 0.000000e+00 : f32
    %8 = vector.broadcast %cst : f32 to vector<16x64xf32>
    %9 = arith.maximumf %7, %8 : vector<16x64xf32>
    %c0_5 = arith.constant 0 : index
    %c0_6 = arith.constant 0 : index
    %10 = vector.load %arg4[%c0_5, %c0_6] : memref<16x64xf32, #tpu.memory_space<vmem>>, vector<16x64xf32>
    tpu.vector_store %arg4[%c0_5, %c0_6], %9 {strides = array<i32>} : memref<16x64xf32, #tpu.memory_space<vmem>>, vector<16x64xf32>,
    return
  }
  func.func @transform_0(%arg0: i32) -> (i32, i32) {
    %c0_i32 = arith.constant 0 : i32
    %c0_i32_0 = arith.constant 0 : i32
    return %arg0, %c0_i32 : i32, i32
  }
  func.func @transform_1(%arg0: i32) -> (i32, i32) {
    %c0_i32 = arith.constant 0 : i32
    %c0_i32_0 = arith.constant 0 : i32
    %c0_i32_1 = arith.constant 0 : i32
    return %c0_i32, %c0_i32_0 : i32, i32
  }
  func.func @transform_2(%arg0: i32) -> (i32, i32) {
    %c0_i32 = arith.constant 0 : i32
    %c0_i32_0 = arith.constant 0 : i32
    %c0_i32_1 = arith.constant 0 : i32
    return %c0_i32, %c0_i32_0 : i32, i32
  }
  func.func @transform_3(%arg0: i32) -> (i32, i32) {
    %c0_i32 = arith.constant 0 : i32
    %c0_i32_0 = arith.constant 0 : i32
    return %arg0, %c0_i32 : i32, i32
  }
}

</mosaic_0001>

<bundles_post_ra>
// kernel: encoder_block_forward.5
= control target key start
LH: loop header
LB: loop body
LE: loop exit
PB: predicated region body
PF: predicated region fallthrough
CT: control target
= control target key end

     0   :  { %vm38_vm0 = vcmask 523264   ;;  %s86_s0 = inlined_call_operand.vmem [shape: bf16[16,64], index: 0, kind: input, shape index: {}]   ;;  %s87_s1 = inlined_call_operand.vmem [shape: f32[1,64], index: 1, kind: input, shape index: {}]   ;;  %s88_s2 = inlined_call_operand.vmem [shape: f32[1,64], index: 2, kind: input, shape index: {}]   ;;  %s89_s3 = inlined_call_operand.vmem [shape: f32[16,64], index: 3, kind: output, shape index: {}]  }
   0x1   :  { %v48_v0 = vld [vmem:[%s86_s0] sm:$0xff]  }
   0x2   :  { %v45_v1 = vld [vmem:[%s87_s1] ss:$0 sm:$0xff]  ;;  %v49_v2 = vunpack.c.l.bf16 %v48_v0  ;;  %v50_v3 = vunpack.c.h.bf16 %v48_v0 }
   0x3   :  { %v46_v4 = vld [vmem:[%s88_s2] ss:$0 sm:$0xff] }
   0x4   :  { %v25_v5 = vmul.f32 %v49_v2, %v45_v1  ;;  %v26_v6 = vmul.f32 %v50_v3, %v45_v1 }
   0x6   :  { %v34_v7 = vadd.f32 %v46_v4, %v25_v5  ;;  %v35_v8 = vadd.f32 %v46_v4, %v26_v6 }
   0x8   :  { %v36_v9 = vmax.f32 %v34_v7, 0.0  ;;  %v37_v10 = vmax.f32 %v35_v8, 0.0 }
   0xa   :  { %39 = vst.msk [vmem:[%s89_s3] sm:$0xff] %vm38_vm0, %v36_v9  ;;  %40 = vst.msk [vmem:[%s89_s3 + $0x8] sm:$0xff] %vm38_vm0, %v37_v10 }

// kernel: encoder_block_forward.4
= control target key start
LH: loop header
LB: loop body
LE: loop exit
PB: predicated region body
PF: predicated region fallthrough
CT: control target
= control target key end

     0   :  { %s1039_s18 = smov 0   ;;  %s1251_s0 = inlined_call_operand.vmem [shape: bf16[2,8,8,8], index: 0, kind: input, shape index: {}]   ;;  %s1252_s1 = inlined_call_operand.vmem [shape: f32[1,8], index: 1, kind: input, shape index: {}]   ;;  %s1253_s2 = inlined_call_operand.vmem [shape: f32[1,8], index: 2, kind: input, shape index: {}]   ;;  %s1254_s3 = inlined_call_operand.vmem [shape: bf16[72,8], index: 3, kind: input, shape index: {}]   ;;  %s1255_s4 = inlined_call_operand.vmem [shape: bf16[2,8,8,8], index: 4, kind: output, shape index: {0}]   ;;  %s1256_s5 = inlined_call_operand.vmem [shape: f32[2,2,8], index: 5, kind: output, shape index: {1}]  }
   0x1 LB: > { %s887_s19 = sadd.s32 4294967295, %s998_s18   ;;  %p891_p0 = scmp.ge.s32.totalorder %s998_s18, 1  ;;  %s998_s18 = sphi %s1039_s18, %s16_s18  }
   0x2   : > { %p190_p1 = scmp.lt.s32.totalorder %s998_s18, 3 }
   0x4   : > { %p191_p2 = pnand %p891_p0, %p190_p1 }
   0x5   : > { %p222_p3 = scmp.lt.s32.totalorder (!%p191_p2), %s887_s19, 1  ;;  %vm291_vm0 = vcmask (!%p191_p2), 64512   ;;  %vm293_vm1 = vcmask (!%p191_p2), 58368   ;;  %vm298_vm2 = vcmask (!%p191_p2), 57344   ;;  %v1000_v0 = vmov (!%p191_p2), 0.0   ;;  %s1001_s28 = smov (!%p191_p2), 8  }
   0x6   : > { %194 = sbr.rel (%p191_p2) target bundleno = 457 (0x1c9), region = 36  ;;  %292 = vst.msk [vmem:[#allocation2] sm:$0xff] (!%p191_p2), %vm291_vm0, %v1000_v0  ;;  %296 = vst.msk [vmem:[#allocation2 + $0x90] sm:$0xff] (!%p191_p2), %vm291_vm0, %v1000_v0  ;;  %v897_v1 = vld [vmem:[%s1252_s1] ss:$0 sm:$0xff] (!%p191_p2)  ;;  %s1002_s29 = smov (!%p191_p2), 16  }
   0x7   : > { %294 = vst.msk [vmem:[#allocation2 + $0x8] sm:$0x3] (!%p191_p2), %vm293_vm1, %v1000_v0  ;;  %297 = vst.msk [vmem:[#allocation2 + $0x98] sm:$0x3] (!%p191_p2), %vm293_vm1, %v1000_v0  ;;  %v898_v10 = vld [vmem:[%s1253_s2] ss:$0 sm:$0xff] (!%p191_p2) }
   0x8   : > { %300 = vst.msk [vmem:[#allocation2 + $0x10] sm:$0x1] (!%p191_p2), %vm298_vm2, %v1000_v0  ;;  %301 = vst.msk [vmem:[#allocation2 + $0x20] sm:$0x1] (!%p191_p2), %vm298_vm2, %v1000_v0  ;;  %s1003_s7 = smov (!%p191_p2), 24   ;;  %s1004_s10 = smov (!%p191_p2), 32  }
   0x9   : > { %302 = vst.msk [vmem:[#allocation2 + $0x30] sm:$0x1] (!%p191_p2), %vm298_vm2, %v1000_v0  ;;  %303 = vst.msk [vmem:[#allocation2 + $0x40] sm:$0x1] (!%p191_p2), %vm298_vm2, %v1000_v0  ;;  %s1005_s13 = smov (!%p191_p2), 40   ;;  %s1006_s16 = smov (!%p191_p2), 48  }
   0xa   : > { %304 = vst.msk [vmem:[#allocation2 + $0x50] sm:$0x1] (!%p191_p2), %vm298_vm2, %v1000_v0  ;;  %305 = vst.msk [vmem:[#allocation2 + $0x60] sm:$0x1] (!%p191_p2), %vm298_vm2, %v1000_v0  ;;  %vm662_vm3 = vcmask (!%p191_p2), 1043456   ;;  %s1007_s22 = smov (!%p191_p2), 56  }
   0xb   : > { %306 = vst.msk [vmem:[#allocation2 + $0x70] sm:$0x1] (!%p191_p2), %vm298_vm2, %v1000_v0  ;;  %307 = vst.msk [vmem:[#allocation2 + $0x80] sm:$0x1] (!%p191_p2), %vm298_vm2, %v1000_v0  ;;  %vm372_vm4 = vcmask (!%p191_p2), 130112   ;;  %vm405_vm5 = vcmask (!%p191_p2), 195712  }
   0xc   : > { %310 = vst.msk [vmem:[#allocation2 + $0x19] sm:$0x1] (!%p191_p2), %vm298_vm2, %v1000_v0  ;;  %311 = vst.msk [vmem:[#allocation2 + $0x29] sm:$0x1] (!%p191_p2), %vm298_vm2, %v1000_v0  ;;  %vm438_vm6 = vcmask (!%p191_p2), 261312   ;;  %vm471_vm7 = vcmask (!%p191_p2), 326912  }
   0xd   : > { %s1258_s19 = smov (!%p222_p3, %s887_s19), 1  ;;  %312 = vst.msk [vmem:[#allocation2 + $0x39] sm:$0x1] %vm298_vm2, %v1000_v0  ;;  %313 = vst.msk [vmem:[#allocation2 + $0x49] sm:$0x1] %vm298_vm2, %v1000_v0  ;;  %vm504_vm8 = vcmask 392512  }
   0xe   : > { %314 = vst.msk [vmem:[#allocation2 + $0x59] sm:$0x1] %vm298_vm2, %v1000_v0  ;;  %315 = vst.msk [vmem:[#allocation2 + $0x69] sm:$0x1] %vm298_vm2, %v1000_v0  ;;  %s910_s20 = sshll.u32 %s1258_s19, 5  ;;  %v344_v39 = vld [vmem:[#allocation2 + $0x1] sm:$0xff] }
   0xf   : > { %316 = vst.msk [vmem:[#allocation2 + $0x79] sm:$0x1] %vm298_vm2, %v1000_v0  ;;  %317 = vst.msk [vmem:[#allocation2 + $0x89] sm:$0x1] %vm298_vm2, %v1000_v0  ;;  %s226_s23 = scalar_lea.vmem %s1251_s0, %s910_s20  ;;  %vm538_vm9 = vcmask 458112   ;;  %vm571_vm10 = vcmask 523712   ;;  %s1209_s26 = scalar_lea.vmem %s1255_s4, %s910_s20 }
  0x10   : > { %299 = vst.msk [vmem:[#allocation2] sm:$0x1] %vm298_vm2, %v1000_v0  ;;  %309 = vst.msk [vmem:[#allocation2 + $0x9] sm:$0x1] %vm298_vm2, %v1000_v0  ;;  %v913_v2 = vld [vmem:[%s226_s23] sm:$0xff]   ;;  %v928_v3 = vld [vmem:[%s226_s23 + $0x8] sm:$0xff]  }
  0x11   : > { %308 = vst.msk [vmem:[#allocation2 + $0x90] sm:$0x1] %vm298_vm2, %v1000_v0  ;;  %318 = vst.msk [vmem:[#allocation2 + $0x99] sm:$0x1] %vm298_vm2, %v1000_v0  ;;  %v929_v4 = vld [vmem:[%s226_s23 + $0x10] sm:$0xff]   ;;  %v914_v5 = vunpack.c.l.bf16 %v913_v2  ;;  %v915_v6 = vunpack.c.h.bf16 %v913_v2  ;;  %v918_v7 = vunpack.c.l.bf16 %v928_v3  ;;  %v919_v8 = vunpack.c.h.bf16 %v928_v3  ;;  %v930_v9 = vld [vmem:[%s226_s23 + $0x18] sm:$0xff]  }
  0x12   : > { %v922_v11 = vunpack.c.l.bf16 %v929_v4  ;;  %v923_v12 = vunpack.c.h.bf16 %v929_v4  ;;  %v926_v13 = vunpack.c.l.bf16 %v930_v9  ;;  %v927_v14 = vunpack.c.h.bf16 %v930_v9  ;;  %v987_v2 = vld [vmem:[%s1254_s3] sm:$0xff]   ;;  %v989_v9 = vld [vmem:[%s1254_s3 + $0x10] sm:$0xff]   ;;  %s1008_s23 = smov 64   ;;  %s896_s20 = sshll.u32 %s1258_s19, 1 }
  0x13   : > { %v260_v15 = vmul.f32 %v914_v5, %v897_v1  ;;  %v261_v16 = vmul.f32 %v915_v6, %v897_v1  ;;  %v262_v17 = vmul.f32 %v918_v7, %v897_v1  ;;  %v263_v18 = vmul.f32 %v919_v8, %v897_v1  ;;  %940 = vmatprep.subr.bf16.mxu0 %v987_v2  ;;  %v988_v6 = vld [vmem:[%s1254_s3 + $0x8] sm:$0xff]  }
  0x14   : > { %v264_v19 = vmul.f32 %v922_v11, %v897_v1  ;;  %v265_v20 = vmul.f32 %v923_v12, %v897_v1  ;;  %v266_v21 = vmul.f32 %v926_v13, %v897_v1  ;;  %v267_v22 = vmul.f32 %v927_v14, %v897_v1  ;;  %958 = vmatprep.subr.bf16.mxu1 %v987_v2  ;;  %v990_v11 = vld [vmem:[%s1254_s3 + $0x18] sm:$0xff]   ;;  %v991_v13 = vld [vmem:[%s1254_s3 + $0x20] ss:$0 sps:$4 sm:$0xff]  }
  0x15   : > { %v275_v23 = vadd.f32 %v898_v10, %v260_v15  ;;  %v276_v24 = vadd.f32 %v898_v10, %v261_v16  ;;  %v277_v25 = vadd.f32 %v898_v10, %v262_v17  ;;  %v278_v26 = vadd.f32 %v898_v10, %v263_v18  ;;  %941 = vmatpush3.bf16.msra.mxu0 %v987_v2 }
  0x16   : > { %v279_v27 = vadd.f32 %v898_v10, %v264_v19  ;;  %v280_v28 = vadd.f32 %v898_v10, %v265_v20  ;;  %v281_v29 = vadd.f32 %v898_v10, %v266_v21  ;;  %v282_v30 = vadd.f32 %v898_v10, %v267_v22  ;;  %963 = vmatpush3.bf16.msra.mxu1 %v987_v2 }
  0x17   : > { %v283_v31 = vmax.f32 %v275_v23, 0.0  ;;  %v284_v32 = vmax.f32 %v276_v24, 0.0  ;;  %v285_v33 = vmax.f32 %v277_v25, 0.0  ;;  %v286_v34 = vmax.f32 %v278_v26, 0.0  ;;  %v377_v40 = vld [vmem:[#allocation2 + $0x2] sm:$0xff]  ;;  %942 = vmatprep.subr.bf16.mxu0 %v988_v6  ;;  %959 = vmatprep.subr.bf16.mxu1 %v988_v6 }
  0x18   : > { %v287_v35 = vmax.f32 %v279_v27, 0.0  ;;  %v288_v36 = vmax.f32 %v280_v28, 0.0  ;;  %v289_v37 = vmax.f32 %v281_v29, 0.0  ;;  %v290_v38 = vmax.f32 %v282_v30, 0.0  ;;  %v328_v41 = vld [vmem:[#allocation2] sm:$0xff] }
  0x19   : > { %320 = vst.msk [vmem:[#allocation2 + $0x11] sm:$0xff] %vm291_vm0, %v283_v31  ;;  %321 = vst.msk [vmem:[#allocation2 + $0x21] sm:$0xff] %vm291_vm0, %v284_v32  ;;  %943 = vmatpush3.bf16.msra.mxu0 %v988_v6  ;;  %v664_v14 = vsel %vm662_vm3, %v991_v13, 0  ;;  %v517_v32 = vld [vmem:[#allocation2 + $0x90] sm:$0xff]  ;;  %vm604_vm11 = vcmask 589312   ;;  %vm649_vm12 = vcmask 588800  }
  0x1a   : > { %322 = vst.msk [vmem:[#allocation2 + $0x31] sm:$0xff] %vm291_vm0, %v285_v33  ;;  %323 = vst.msk [vmem:[#allocation2 + $0x41] sm:$0xff] %vm291_vm0, %v286_v34  ;;  %964 = vmatpush3.bf16.msra.mxu1 %v988_v6  ;;  %944 = vmatprep.subr.bf16.mxu0 %v989_v9  ;;  %v550_v34 = vld [vmem:[#allocation2 + $0x91] sm:$0xff]  ;;  %vm739_vm13 = vcmask 60416   ;;  %vm798_vm14 = vcmask 1040384  }
  0x1b   : > { %324 = vst.msk [vmem:[#allocation2 + $0x51] sm:$0xff] %vm291_vm0, %v287_v35  ;;  %325 = vst.msk [vmem:[#allocation2 + $0x61] sm:$0xff] %vm291_vm0, %v288_v36  ;;  %960 = vmatprep.subr.bf16.mxu1 %v989_v9  ;;  %v583_v36 = vld [vmem:[#allocation2 + $0x92] sm:$0xff] }
  0x1c   : > { %326 = vst.msk [vmem:[#allocation2 + $0x71] sm:$0xff] %vm291_vm0, %v289_v37  ;;  %327 = vst.msk [vmem:[#allocation2 + $0x81] sm:$0xff] %vm291_vm0, %v290_v38 }
  0x1d   : > { %945 = vmatpush3.bf16.msra.mxu0 %v989_v9 }
  0x1e   : > { %965 = vmatpush3.bf16.msra.mxu1 %v989_v9  ;;  %946 = vmatprep.subr.bf16.mxu0 %v990_v11 }
  0x1f   : > { %961 = vmatprep.subr.bf16.mxu1 %v990_v11 }
  0x20   : > { %v345_v42 = vld [vmem:[#allocation2 + $0x11] sm:$0xff]  ;;  %v346_v44 = vld [vmem:[#allocation2 + $0x21] sm:$0xff] }
  0x21   : > { %v378_v43 = vld [vmem:[#allocation2 + $0x12] sm:$0xff]  ;;  %v352_v45 = vpack.c.bf16 %v345_v42, %v344_v39  ;;  %v379_v48 = vld [vmem:[#allocation2 + $0x22] sm:$0xff]  ;;  %v451_v3 = vpack.c.bf16 %v346_v44, %v345_v42  ;;  %947 = vmatpush3.bf16.msra.mxu0 %v990_v11 }
  0x22   : > { %v385_v46 = vpack.c.bf16 %v378_v43, %v377_v40  ;;  %v347_v47 = vld [vmem:[#allocation2 + $0x31] sm:$0xff]  ;;  %v411_v52 = vld [vmem:[#allocation2 + $0x20] sm:$0xff]  ;;  %v484_v7 = vpack.c.bf16 %v379_v48, %v378_v43  ;;  %966 = vmatpush3.bf16.msra.mxu1 %v990_v11  ;;  %968 = vmatprep.subr.msk.bf16.mxu0 %vm662_vm3, %v991_v13 }
  0x23   : > { %v380_v49 = vld [vmem:[#allocation2 + $0x32] sm:$0xff]  ;;  %v1093_v50 = vpack.c.bf16 %v347_v47, %v346_v44  ;;  %360 = vrot.lane.b32.xlu0 %v352_v45, %s1001_s28  ;;  %v413_v57 = vld [vmem:[#allocation2 + $0x40] sm:$0xff]  ;;  %969 = vmatprep.subr.msk.bf16.mxu1 %vm662_vm3, %v991_v13 }
  0x24   : > { %v410_v51 = vld [vmem:[#allocation2 + $0x10] sm:$0xff]  ;;  %393 = vrot.lane.b32.xlu1 %v385_v46, %s1002_s29  ;;  %v1097_v54 = vpack.c.bf16 %v380_v49, %v379_v48  ;;  %v1104_v60 = vld [vmem:[#allocation2 + $0x60] sm:$0xff] }
  0x25   : > { %v412_v53 = vld [vmem:[#allocation2 + $0x30] sm:$0xff]  ;;  %v336_v56 = vpack.c.bf16 %v410_v51, %v328_v41  ;;  %v418_v62 = vpack.c.bf16 %v411_v52, %v410_v51  ;;  %v446_v1 = vld [vmem:[#allocation2 + $0x41] sm:$0xff]  ;;  %949 = vmatpush3.bf16.msra.mxu0 %v664_v14 }
  0x26   : > { %v518_v55 = vpack.c.bf16 %v412_v53, %v411_v52  ;;  %v1099_v58 = vld [vmem:[#allocation2 + $0x50] sm:$0xff]  ;;  %v419_v63 = vpack.c.bf16 %v413_v57, %v412_v53  ;;  %v452_v4 = vpack.c.bf16 %v446_v1, %v347_v47  ;;  %v479_v5 = vld [vmem:[#allocation2 + $0x42] sm:$0xff]  ;;  %967 = vmatpush3.bf16.msra.mxu1 %v664_v14 }
  0x27   : > { %v519_v59 = vpack.c.bf16 %v1099_v58, %v413_v57  ;;  %340 = vst.msk [vmem:[#allocation3] sm:$0xff] %vm291_vm0, %v336_v56  ;;  %v1106_v61 = vld [vmem:[#allocation2 + $0x70] sm:$0xff]  ;;  %362 = vrot.lane.b32.xlu0 %v1093_v50, %s1001_s28  ;;  %v485_v8 = vpack.c.bf16 %v479_v5, %v380_v49  ;;  %v350_v16 = vld [vmem:[#allocation2 + $0x61] sm:$0xff]  ;;  %v420_v24 = vpack.c.bf16 %v1104_v60, %v1099_v58 }
  0x28   : > { %341 = vst.msk [vmem:[#allocation3 + $0x8] sm:$0xff] %vm291_vm0, %v518_v55  ;;  %395 = vrot.lane.b32.xlu1 %v1097_v54, %s1002_s29  ;;  %v1114_v0 = vpack.c.bf16 %v1106_v61, %v1104_v60  ;;  %v546_v10 = vld [vmem:[#allocation2 + $0x51] sm:$0xff]  ;;  %v383_v20 = vld [vmem:[#allocation2 + $0x62] sm:$0xff] }
  0x29   : > { %342 = vst.msk [vmem:[#allocation3 + $0x10] sm:$0xff] %vm291_vm0, %v519_v59  ;;  %v552_v12 = vpack.c.bf16 %v546_v10, %v446_v1  ;;  %v579_v15 = vld [vmem:[#allocation2 + $0x52] sm:$0xff]  ;;  %v417_v23 = vld [vmem:[#allocation2 + $0x80] sm:$0xff]  ;;  %v453_v27 = vpack.c.bf16 %v350_v16, %v546_v10 }
  0x2a   : > { %343 = vst.msk [vmem:[#allocation3 + $0x18] sm:$0xff] %vm291_vm0, %v1114_v0  ;;  %v351_v17 = vld [vmem:[#allocation2 + $0x71] sm:$0xff]  ;;  %v585_v18 = vpack.c.bf16 %v579_v15, %v479_v5  ;;  %v421_v25 = vpack.c.bf16 %v417_v23, %v1106_v61  ;;  %v450_v26 = vld [vmem:[#allocation2 + $0x81] sm:$0xff]  ;;  %v486_v30 = vpack.c.bf16 %v383_v20, %v579_v15  ;;  %v521_v33 = vpack.c.bf16 %v517_v32, %v417_v23 }
  0x2b   : > { %426 = vrot.lane.b32.xlu0 %v418_v62, %s1003_s7  ;;  %v355_v19 = vpack.c.bf16 %v351_v17, %v350_v16  ;;  %v384_v21 = vld [vmem:[#allocation2 + $0x72] sm:$0xff]  ;;  %v454_v28 = vpack.c.bf16 %v450_v26, %v351_v17  ;;  %v483_v29 = vld [vmem:[#allocation2 + $0x82] sm:$0xff]  ;;  %v554_v35 = vpack.c.bf16 %v550_v34, %v450_v26 }
  0x2c   : > { %428 = vrot.lane.b32.xlu1 %v419_v63, %s1003_s7  ;;  %v388_v22 = vpack.c.bf16 %v384_v21, %v383_v20  ;;  %v487_v31 = vpack.c.bf16 %v483_v29, %v384_v21  ;;  %v587_v37 = vpack.c.bf16 %v583_v36, %v483_v29 }
  0x2f   : > { %459 = vrot.lane.b32.xlu0 %v451_v3, %s1004_s10 }
  0x30   : > { %461 = vrot.lane.b32.xlu1 %v452_v4, %s1004_s10 }
  0x33   : > { %492 = vrot.lane.b32.xlu0 %v484_v7, %s1005_s13 }
  0x34   : > { %494 = vrot.lane.b32.xlu1 %v485_v8, %s1005_s13 }
  0x37   : > { %526 = vrot.lane.b32.xlu0 %v518_v55, %s1006_s16 }
  0x38   : > { %528 = vrot.lane.b32.xlu1 %v519_v59, %s1006_s16 }
  0x3b   : > { %559 = vrot.lane.b32.xlu0 %v1093_v50, %s1007_s22 }
  0x3c   : > { %561 = vrot.lane.b32.xlu1 %v552_v12, %s1007_s22 }
  0x3f   : > { %592 = vrot.lane.b32.xlu0 %v1097_v54, %s1008_s23 }
  0x40   : > { %364 = vrot.lane.b32.xlu1 %v552_v12, %s1001_s28 }
  0x43   : > { %594 = vrot.lane.b32.xlu0 %v585_v18, %s1008_s23 }
  0x44   : > { %366 = vrot.lane.b32.xlu1 %v355_v19, %s1001_s28 }
  0x47   : > { %397 = vrot.lane.b32.xlu0 %v585_v18, %s1002_s29 }
  0x48   : > { %399 = vrot.lane.b32.xlu1 %v388_v22, %s1002_s29  ;;  %s235_s29 = scalar_lea.vmem %s1256_s5, %s896_s20 }
  0x4b   : > { %430 = vrot.lane.b32.xlu0 %v420_v24, %s1003_s7 }
  0x4c   : > { %432 = vrot.lane.b32.xlu1 %v421_v25, %s1003_s7 }
  0x4f   : > { %463 = vrot.lane.b32.xlu0 %v453_v27, %s1004_s10 }
  0x50   : > { %465 = vrot.lane.b32.xlu1 %v454_v28, %s1004_s10 }
  0x53   : > { %496 = vrot.lane.b32.xlu0 %v486_v30, %s1005_s13 }
  0x54   : > { %498 = vrot.lane.b32.xlu1 %v487_v31, %s1005_s13 }
  0x57   : > { %530 = vrot.lane.b32.xlu0 %v1114_v0, %s1006_s16 }
  0x58   : > { %532 = vrot.lane.b32.xlu1 %v521_v33, %s1006_s16 }
  0x5b   : > { %563 = vrot.lane.b32.xlu0 %v355_v19, %s1007_s22 }
  0x5c   : > { %565 = vrot.lane.b32.xlu1 %v554_v35, %s1007_s22 }
  0x5f   : > { %596 = vrot.lane.b32.xlu0 %v388_v22, %s1008_s23 }
  0x60   : > { %598 = vrot.lane.b32.xlu1 %v587_v37, %s1008_s23 }
  0x95   : > { %v361_v38 = vpop.permute.xlu0 %360 }
  0x96   : > { %v394_v39 = vpop.permute.xlu1 %393  ;;  %373 = vst.msk [vmem:[#allocation3] sm:$0xff] %vm372_vm4, %v361_v38 }
  0x97   : > { %406 = vst.msk [vmem:[#allocation3] sm:$0xff] %vm405_vm5, %v394_v39 }
  0x99   : > { %v363_v40 = vpop.permute.xlu0 %362 }
  0x9a   : > { %v396_v41 = vpop.permute.xlu1 %395  ;;  %374 = vst.msk [vmem:[#allocation3 + $0x8] sm:$0xff] %vm372_vm4, %v363_v40 }
  0x9b   : > { %407 = vst.msk [vmem:[#allocation3 + $0x8] sm:$0xff] %vm405_vm5, %v396_v41 }
  0x9d   : > { %v427_v42 = vpop.permute.xlu0 %426 }
  0x9e   : > { %v429_v43 = vpop.permute.xlu1 %428  ;;  %439 = vst.msk [vmem:[#allocation3] sm:$0xff] %vm438_vm6, %v427_v42 }
  0x9f   : > { %440 = vst.msk [vmem:[#allocation3 + $0x8] sm:$0xff] %vm438_vm6, %v429_v43 }
  0xa1   : > { %v460_v44 = vpop.permute.xlu0 %459 }
  0xa2   : > { %v462_v45 = vpop.permute.xlu1 %461  ;;  %472 = vst.msk [vmem:[#allocation3] sm:$0xff] %vm471_vm7, %v460_v44 }
  0xa3   : > { %473 = vst.msk [vmem:[#allocation3 + $0x8] sm:$0xff] %vm471_vm7, %v462_v45 }
  0xa5   : > { %v493_v46 = vpop.permute.xlu0 %492 }
  0xa6   : > { %v495_v47 = vpop.permute.xlu1 %494  ;;  %505 = vst.msk [vmem:[#allocation3] sm:$0xff] %vm504_vm8, %v493_v46 }
  0xa7   : > { %506 = vst.msk [vmem:[#allocation3 + $0x8] sm:$0xff] %vm504_vm8, %v495_v47 }
  0xa9   : > { %v527_v48 = vpop.permute.xlu0 %526 }
  0xaa   : > { %v529_v49 = vpop.permute.xlu1 %528  ;;  %539 = vst.msk [vmem:[#allocation3] sm:$0xff] %vm538_vm9, %v527_v48 }
  0xab   : > { %540 = vst.msk [vmem:[#allocation3 + $0x8] sm:$0xff] %vm538_vm9, %v529_v49 }
  0xad   : > { %v560_v50 = vpop.permute.xlu0 %559 }
  0xae   : > { %v562_v51 = vpop.permute.xlu1 %561  ;;  %572 = vst.msk [vmem:[#allocation3] sm:$0xff] %vm571_vm10, %v560_v50 }
  0xaf   : > { %573 = vst.msk [vmem:[#allocation3 + $0x8] sm:$0xff] %vm571_vm10, %v562_v51 }
  0xb1   : > { %v593_v52 = vpop.permute.xlu0 %592 }
  0xb2   : > { %v365_v53 = vpop.permute.xlu1 %364  ;;  %605 = vst.msk [vmem:[#allocation3] sm:$0xff] %vm604_vm11, %v593_v52 }
  0xb3   : > { %375 = vst.msk [vmem:[#allocation3 + $0x10] sm:$0xff] %vm372_vm4, %v365_v53 }
  0xb5   : > { %v595_v54 = vpop.permute.xlu0 %594 }
  0xb6   : > { %v367_v55 = vpop.permute.xlu1 %366  ;;  %606 = vst.msk [vmem:[#allocation3 + $0x8] sm:$0xff] %vm604_vm11, %v595_v54 }
  0xb7   : > { %376 = vst.msk [vmem:[#allocation3 + $0x18] sm:$0xff] %vm372_vm4, %v367_v55 }
  0xb9   : > { %v398_v56 = vpop.permute.xlu0 %397  ;;  %v609_v58 = vld [vmem:[#allocation3] sm:$0xff] }
  0xba   : > { %v400_v57 = vpop.permute.xlu1 %399  ;;  %408 = vst.msk [vmem:[#allocation3 + $0x10] sm:$0xff] %vm405_vm5, %v398_v56  ;;  %950 = vmatprep.mubr.msk.bf16.mxu0 %vm649_vm12, %v609_v58 }
  0xbb   : > { %409 = vst.msk [vmem:[#allocation3 + $0x18] sm:$0xff] %vm405_vm5, %v400_v57 }
  0xbd   : > { %v431_v59 = vpop.permute.xlu0 %430  ;;  %v610_v61 = vld [vmem:[#allocation3 + $0x8] sm:$0xff] }
  0xbe   : > { %v433_v60 = vpop.permute.xlu1 %432  ;;  %441 = vst.msk [vmem:[#allocation3 + $0x10] sm:$0xff] %vm438_vm6, %v431_v59  ;;  %951 = vmatmul.mubr.msk.bf16.vlgmr.msra.gmra.mrb[0].mxu0 %vm649_vm12, %v610_v61 }
  0xbf   : > { %442 = vst.msk [vmem:[#allocation3 + $0x18] sm:$0xff] %vm438_vm6, %v433_v60 }
  0xc1   : > { %v464_v62 = vpop.permute.xlu0 %463 }
  0xc2   : > { %v466_v63 = vpop.permute.xlu1 %465  ;;  %474 = vst.msk [vmem:[#allocation3 + $0x10] sm:$0xff] %vm471_vm7, %v464_v62 }
  0xc3   : > { %475 = vst.msk [vmem:[#allocation3 + $0x18] sm:$0xff] %vm471_vm7, %v466_v63 }
  0xc5   : > { %v497_v0 = vpop.permute.xlu0 %496 }
  0xc6   : > { %v499_v1 = vpop.permute.xlu1 %498  ;;  %507 = vst.msk [vmem:[#allocation3 + $0x10] sm:$0xff] %vm504_vm8, %v497_v0 }
  0xc7   : > { %508 = vst.msk [vmem:[#allocation3 + $0x18] sm:$0xff] %vm504_vm8, %v499_v1 }
  0xc9   : > { %v531_v2 = vpop.permute.xlu0 %530 }
  0xca   : > { %v533_v3 = vpop.permute.xlu1 %532  ;;  %541 = vst.msk [vmem:[#allocation3 + $0x10] sm:$0xff] %vm538_vm9, %v531_v2 }
  0xcb   : > { %542 = vst.msk [vmem:[#allocation3 + $0x18] sm:$0xff] %vm538_vm9, %v533_v3 }
  0xcd   : > { %v564_v4 = vpop.permute.xlu0 %563 }
  0xce   : > { %v566_v5 = vpop.permute.xlu1 %565  ;;  %574 = vst.msk [vmem:[#allocation3 + $0x10] sm:$0xff] %vm571_vm10, %v564_v4 }
  0xcf   : > { %575 = vst.msk [vmem:[#allocation3 + $0x18] sm:$0xff] %vm571_vm10, %v566_v5 }
  0xd1   : > { %v597_v6 = vpop.permute.xlu0 %596 }
  0xd2   : > { %v599_v7 = vpop.permute.xlu1 %598  ;;  %607 = vst.msk [vmem:[#allocation3 + $0x10] sm:$0xff] %vm604_vm11, %v597_v6 }
  0xd3   : > { %608 = vst.msk [vmem:[#allocation3 + $0x18] sm:$0xff] %vm604_vm11, %v599_v7 }
  0xd9   : > { %v611_v8 = vld [vmem:[#allocation3 + $0x10] sm:$0xff] }
  0xda   : > { %v612_v9 = vld [vmem:[#allocation3 + $0x18] sm:$0xff]  ;;  %954 = vmatprep.mubr.msk.bf16.mxu1 %vm649_vm12, %v611_v8 }
  0xdb   : > { %955 = vmatmul.mubr.msk.bf16.vlgmr.msra.gmra.mrb[0].mxu1 %vm649_vm12, %v612_v9 }
 0x191   : > { %v952_v10 = vpop.f32.mrb[0].mxu0 }
 0x192   : > { %v733_v11 = vpack.c.bf16 %v952_v10, %v952_v10  ;;  %v700_v12 = vpop.f32.mrb[1].mxu0  ;;  %v771_v16 = vmul.f32 %v952_v10, %v952_v10  ;;  %v751_v24 = vsel %vm291_vm0, %v952_v10, 0.0 }
 0x193   : > { %v731_v13 = vpack.c.bf16 %v700_v12, %v700_v12  ;;  %v769_v14 = vmul.f32 %v700_v12, %v700_v12  ;;  %v953_v15 = vpop.f32.mrb[2].mxu0  ;;  %v748_v19 = vsel %vm291_vm0, %v700_v12, 0.0 }
 0x194   : > { %742 = vst.msk [vmem:[%s1209_s26 + $0x8] sm:$0xf] %vm739_vm13, %v733_v11  ;;  %v734_v17 = vpack.c.bf16 %v953_v15, %v953_v15  ;;  %v703_v18 = vpop.f32.mrb[3].mxu0  ;;  %v772_v26 = vmul.f32 %v953_v15, %v953_v15  ;;  %v780_v30 = vsel %vm291_vm0, %v771_v16, 0.0  ;;  %v753_v31 = vsel %vm291_vm0, %v953_v15, 0.0 }
 0x195   : > { %740 = vst.msk [vmem:[%s1209_s26] sm:$0xf] %vm739_vm13, %v731_v13  ;;  %v732_v20 = vpack.c.bf16 %v703_v18, %v703_v18  ;;  %v749_v21 = vsel %vm291_vm0, %v703_v18, 0.0  ;;  %v770_v22 = vmul.f32 %v703_v18, %v703_v18  ;;  %v777_v25 = vsel %vm291_vm0, %v769_v14, 0.0 }
 0x196   : > { %743 = vst.msk [vmem:[%s1209_s26 + $0xc] sm:$0xf] %vm739_vm13, %v734_v17  ;;  %v750_v23 = vadd.f32 %v749_v21, %v748_v19  ;;  %v782_v34 = vsel %vm291_vm0, %v772_v26, 0.0 }
 0x197   : > { %741 = vst.msk [vmem:[%s1209_s26 + $0x4] sm:$0xf] %vm739_vm13, %v732_v20  ;;  %v778_v27 = vsel %vm291_vm0, %v770_v22, 0.0 }
 0x198   : > { %v752_v28 = vadd.f32 %v751_v24, %v750_v23  ;;  %v779_v29 = vadd.f32 %v778_v27, %v777_v25 }
 0x19a   : > { %v781_v32 = vadd.f32 %v780_v30, %v779_v29  ;;  %v754_v33 = vadd.f32 %v753_v31, %v752_v28 }
 0x19c   : > { %v783_v35 = vadd.f32 %v782_v34, %v781_v32 }
 0x1ae   : > { %v956_v36 = vpop.f32.mrb[0].mxu1 }
 0x1af   : > { %v737_v37 = vpack.c.bf16 %v956_v36, %v956_v36  ;;  %v716_v38 = vpop.f32.mrb[1].mxu1  ;;  %v775_v49 = vmul.f32 %v956_v36, %v956_v36  ;;  %v759_v53 = vsel %vm291_vm0, %v956_v36, 0.0 }
 0x1b0   : > { %v735_v39 = vpack.c.bf16 %v716_v38, %v716_v38  ;;  %v755_v40 = vsel %vm291_vm0, %v716_v38, 0.0  ;;  %v773_v41 = vmul.f32 %v716_v38, %v716_v38  ;;  %v957_v42 = vpop.f32.mrb[2].mxu1 }
 0x1b1   : > { %746 = vst.msk [vmem:[%s1209_s26 + $0x18] sm:$0xf] %vm739_vm13, %v737_v37  ;;  %v756_v43 = vadd.f32 %v755_v40, %v754_v33  ;;  %v738_v44 = vpack.c.bf16 %v957_v42, %v957_v42  ;;  %v719_v45 = vpop.f32.mrb[3].mxu1  ;;  %v776_v54 = vmul.f32 %v957_v42, %v957_v42  ;;  %v761_v57 = vsel %vm291_vm0, %v957_v42, 0.0 }
 0x1b2   : > { %744 = vst.msk [vmem:[%s1209_s26 + $0x10] sm:$0xf] %vm739_vm13, %v735_v39  ;;  %v784_v46 = vsel %vm291_vm0, %v773_v41, 0.0  ;;  %v736_v47 = vpack.c.bf16 %v719_v45, %v719_v45  ;;  %v757_v48 = vsel %vm291_vm0, %v719_v45, 0.0  ;;  %v774_v52 = vmul.f32 %v719_v45, %v719_v45 }
 0x1b3   : > { %v785_v50 = vadd.f32 %v784_v46, %v783_v35  ;;  %747 = vst.msk [vmem:[%s1209_s26 + $0x1c] sm:$0xf] %vm739_vm13, %v738_v44  ;;  %v758_v51 = vadd.f32 %v757_v48, %v756_v43  ;;  %v788_v59 = vsel %vm291_vm0, %v775_v49, 0.0  ;;  %v790_v62 = vsel %vm291_vm0, %v776_v54, 0.0 }
 0x1b4   : > { %745 = vst.msk [vmem:[%s1209_s26 + $0x14] sm:$0xf] %vm739_vm13, %v736_v47  ;;  %v786_v56 = vsel %vm291_vm0, %v774_v52, 0.0 }
 0x1b5   : > { %v760_v55 = vadd.f32 %v759_v53, %v758_v51  ;;  %v787_v58 = vadd.f32 %v786_v56, %v785_v50 }
 0x1b7   : > { %v762_v60 = vadd.f32 %v761_v57, %v760_v55  ;;  %v789_v61 = vadd.f32 %v788_v59, %v787_v58 }
 0x1b9   : > { %v763_v63 = vrot.slane %v762_v60, 4  ;;  %v791_v0 = vadd.f32 %v790_v62, %v789_v61 }
 0x1bb   : > { %v764_v1 = vadd.f32 %v763_v63, %v762_v60  ;;  %v792_v2 = vrot.slane %v791_v0, 4 }
 0x1bd   : > { %v765_v3 = vrot.slane %v764_v1, 2  ;;  %v793_v4 = vadd.f32 %v792_v2, %v791_v0 }
 0x1bf   : > { %v766_v5 = vadd.f32 %v765_v3, %v764_v1  ;;  %v794_v6 = vrot.slane %v793_v4, 2 }
 0x1c1   : > { %v767_v7 = vrot.slane %v766_v5, 1  ;;  %v795_v8 = vadd.f32 %v794_v6, %v793_v4 }
 0x1c3   : > { %v796_v9 = vrot.slane %v795_v8, 1  ;;  %v768_v10 = vadd.f32 %v767_v7, %v766_v5 }
 0x1c5   : > { %v797_v11 = vadd.f32 %v796_v9, %v795_v8 }
 0x1c7   : > { %v799_v12 = vsel %vm798_vm14, %v768_v10, %v797_v11 }
 0x1c8   : > { %800 = vst.msk [vmem:[%s235_s29] sm:$0x3] %vm293_vm1, %v799_v12 }
 0x1c9 PF: > { %s16_s18 = sadd.s32 1, %s998_s18  }
 0x1ca   : > { %p13_p4 = scmp.ge.s32.totalorder %s16_s18, 4  }
 0x1cc   :  { %15 = sbr.rel (!%p13_p4) target bundleno = 1 (0x1), region = 81 }

// kernel: encoder_block_forward.3
= control target key start
LH: loop header
LB: loop body
LE: loop exit
PB: predicated region body
PF: predicated region fallthrough
CT: control target
= control target key end

     0   :  { %s1322_s12 = smov 0   ;;  %s1598_s0 = inlined_call_operand.vmem [shape: bf16[2,16,16,4], index: 0, kind: input, shape index: {}]   ;;  %s1599_s1 = inlined_call_operand.vmem [shape: bf16[36,8], index: 1, kind: input, shape index: {}]   ;;  %s1600_s2 = inlined_call_operand.vmem [shape: bf16[2,8,8,8], index: 2, kind: output, shape index: {0}]   ;;  %s1601_s3 = inlined_call_operand.vmem [shape: f32[2,2,8], index: 3, kind: output, shape index: {1}]  }
   0x1 LB: > { %s1134_s13 = sadd.s32 4294967295, %s1290_s12   ;;  %p1138_p0 = scmp.ge.s32.totalorder %s1290_s12, 1  ;;  %s1290_s12 = sphi %s1322_s12, %s14_s12  }
   0x2   : > { %p140_p1 = scmp.lt.s32.totalorder %s1290_s12, 3 }
   0x4   : > { %p141_p2 = pnand %p1138_p0, %p140_p1 }
   0x5   : > { %p1332_p3 = scmp.lt.s32.totalorder (!%p141_p2), %s1134_s13, 1  ;;  %vm183_vm0 = vcmask (!%p141_p2), 31744   ;;  %vm186_vm1 = vcmask (!%p141_p2), 24576   ;;  %v1292_v0 = vmov (!%p141_p2), -inf   ;;  %v1293_v1 = vmov (!%p141_p2), 0.0   ;;  %s1294_s19 = smov (!%p141_p2), 4  }
   0x6   : > { %144 = sbr.rel (%p141_p2) target bundleno = 485 (0x1e5), region = 28  ;;  %184 = vst.msk [vmem:[#allocation2] sm:$0xff] (!%p141_p2), %vm183_vm0, %v1292_v0  ;;  %185 = vst.msk [vmem:[#allocation2 + $0x8] sm:$0xff] (!%p141_p2), %vm183_vm0, %v1292_v0  ;;  %vm509_vm2 = vcmask (!%p141_p2), 25600   ;;  %s1295_s20 = smov (!%p141_p2), 8   ;;  %vm861_vm3 = vcmask (!%p141_p2), 1041408  }
   0x7   : > { %187 = vst.msk [vmem:[#allocation2 + $0x10] sm:$0x1] (!%p141_p2), %vm186_vm1, %v1292_v0  ;;  %189 = vst.msk [vmem:[#allocation2 + $0x18] sm:$0x1] (!%p141_p2), %vm186_vm1, %v1292_v0  ;;  %s1296_s21 = smov (!%p141_p2), 12   ;;  %s1297_s22 = smov (!%p141_p2), 16  }
   0x8   : > { %190 = vst.msk [vmem:[#allocation2 + $0x30] sm:$0x1] (!%p141_p2), %vm186_vm1, %v1292_v0  ;;  %191 = vst.msk [vmem:[#allocation2 + $0x48] sm:$0x1] (!%p141_p2), %vm186_vm1, %v1292_v0  ;;  %s1298_s25 = smov (!%p141_p2), 20   ;;  %s1299_s28 = smov (!%p141_p2), 24  }
   0x9   : > { %508 = vst.msk [vmem:[#allocation3] sm:$0xff] (!%p141_p2), %vm183_vm0, %v1293_v1  ;;  %512 = vst.msk [vmem:[#allocation3 + $0x90] sm:$0xff] (!%p141_p2), %vm183_vm0, %v1293_v1  ;;  %s1300_s4 = smov (!%p141_p2), 28   ;;  %s1301_s5 = smov (!%p141_p2), 32   ;;  %vm587_vm4 = vcmask (!%p141_p2), 64544   ;;  %vm620_vm5 = vcmask (!%p141_p2), 97344  }
   0xa   : > { %192 = vst.msk [vmem:[#allocation2 + $0x60] sm:$0x1] (!%p141_p2), %vm186_vm1, %v1292_v0  ;;  %193 = vst.msk [vmem:[#allocation2 + $0x78] sm:$0x1] (!%p141_p2), %vm186_vm1, %v1292_v0  ;;  %vm653_vm6 = vcmask (!%p141_p2), 130144   ;;  %vm686_vm7 = vcmask (!%p141_p2), 162944  }
   0xb   : > { %194 = vst.msk [vmem:[#allocation2 + $0x90] sm:$0x1] (!%p141_p2), %vm186_vm1, %v1292_v0  ;;  %195 = vst.msk [vmem:[#allocation2 + $0xa8] sm:$0x1] (!%p141_p2), %vm186_vm1, %v1292_v0  ;;  %vm719_vm8 = vcmask (!%p141_p2), 195744   ;;  %vm753_vm9 = vcmask (!%p141_p2), 228544  }
   0xc   : > { %196 = vst.msk [vmem:[#allocation2 + $0xc0] sm:$0x1] (!%p141_p2), %vm186_vm1, %v1292_v0  ;;  %197 = vst.msk [vmem:[#allocation2 + $0xd8] sm:$0x1] (!%p141_p2), %vm186_vm1, %v1292_v0  ;;  %vm786_vm10 = vcmask (!%p141_p2), 261344   ;;  %vm819_vm11 = vcmask (!%p141_p2), 294144  }
   0xd   : > { %198 = vst.msk [vmem:[#allocation2 + $0xf0] sm:$0x1] %vm186_vm1, %v1292_v0  ;;  %199 = vst.msk [vmem:[#allocation2 + $0x108] sm:$0x1] %vm186_vm1, %v1292_v0  ;;  %s1604_s13 = smov (!%p1332_p3, %s1134_s13), 1  ;;  %vm848_vm12 = vcmask 293888  }
   0xe   : > { %200 = vst.msk [vmem:[#allocation2 + $0x120] sm:$0x1] %vm186_vm1, %v1292_v0  ;;  %201 = vst.msk [vmem:[#allocation2 + $0x138] sm:$0x1] %vm186_vm1, %v1292_v0  ;;  %s1153_s15 = sshll.u32 %s1604_s13, 7  ;;  %s1154_s6 = sshll.u32 %s1604_s13, 5 }
   0xf   : > { %202 = vst.msk [vmem:[#allocation2 + $0x150] sm:$0x1] %vm186_vm1, %v1292_v0  ;;  %203 = vst.msk [vmem:[#allocation2 + $0x168] sm:$0x1] %vm186_vm1, %v1292_v0  ;;  %s1390_s18 = scalar_lea.vmem %s1598_s0, %s1153_s15  ;;  %v318_v12 = vld [vmem:[#allocation2 + $0x1] ss:$2 sm:$0xff]  ;;  %s1557_s9 = scalar_lea.vmem %s1600_s2, %s1154_s6 }
  0x10   : > { %204 = vst.msk [vmem:[#allocation2 + $0x180] sm:$0x1] %vm186_vm1, %v1292_v0  ;;  %515 = vst.msk [vmem:[#allocation3 + $0x10] sm:$0x1] %vm186_vm1, %v1293_v1  ;;  %v1156_v2 = vld [vmem:[%s1390_s18] sm:$0xff]   ;;  %v1219_v3 = vld [vmem:[%s1390_s18 + $0x8] sm:$0xff]  }
  0x11   : > { %516 = vst.msk [vmem:[#allocation3 + $0x20] sm:$0x1] %vm186_vm1, %v1293_v1  ;;  %517 = vst.msk [vmem:[#allocation3 + $0x30] sm:$0x1] %vm186_vm1, %v1293_v1  ;;  %v1220_v4 = vld [vmem:[%s1390_s18 + $0x10] sm:$0xff]   ;;  %v1157_v5 = vunpack.c.l.bf16 %v1156_v2  ;;  %v1158_v6 = vunpack.c.h.bf16 %v1156_v2  ;;  %v1161_v7 = vunpack.c.l.bf16 %v1219_v3  ;;  %v1162_v8 = vunpack.c.h.bf16 %v1219_v3  ;;  %v1221_v9 = vld [vmem:[%s1390_s18 + $0x18] sm:$0xff]  }
  0x12   : > { %518 = vst.msk [vmem:[#allocation3 + $0x40] sm:$0x1] %vm186_vm1, %v1293_v1  ;;  %519 = vst.msk [vmem:[#allocation3 + $0x50] sm:$0x1] %vm186_vm1, %v1293_v1  ;;  %v1222_v10 = vld [vmem:[%s1390_s18 + $0x20] sm:$0xff]   ;;  %v1223_v11 = vld [vmem:[%s1390_s18 + $0x28] sm:$0xff]   ;;  %v1165_v13 = vunpack.c.l.bf16 %v1220_v4  ;;  %v1166_v14 = vunpack.c.h.bf16 %v1220_v4  ;;  %v1169_v15 = vunpack.c.l.bf16 %v1221_v9  ;;  %v1170_v16 = vunpack.c.h.bf16 %v1221_v9 }
  0x13   : > { %520 = vst.msk [vmem:[#allocation3 + $0x60] sm:$0x1] %vm186_vm1, %v1293_v1  ;;  %521 = vst.msk [vmem:[#allocation3 + $0x70] sm:$0x1] %vm186_vm1, %v1293_v1  ;;  %v1224_v17 = vld [vmem:[%s1390_s18 + $0x30] sm:$0xff]   ;;  %v1173_v20 = vunpack.c.l.bf16 %v1222_v10  ;;  %v1174_v21 = vunpack.c.h.bf16 %v1222_v10  ;;  %v1177_v22 = vunpack.c.l.bf16 %v1223_v11  ;;  %v1178_v23 = vunpack.c.h.bf16 %v1223_v11  ;;  %v1225_v24 = vld [vmem:[%s1390_s18 + $0x38] sm:$0xff]  }
  0x14   : > { %522 = vst.msk [vmem:[#allocation3 + $0x80] sm:$0x1] %vm186_vm1, %v1293_v1  ;;  %525 = vst.msk [vmem:[#allocation3 + $0x19] sm:$0x1] %vm186_vm1, %v1293_v1  ;;  %v342_v19 = vld [vmem:[#allocation2 + $0x2] ss:$2 sm:$0xff]  ;;  %v1181_v26 = vunpack.c.l.bf16 %v1224_v17  ;;  %v1182_v27 = vunpack.c.h.bf16 %v1224_v17  ;;  %v1185_v28 = vunpack.c.l.bf16 %v1225_v24  ;;  %v1186_v31 = vunpack.c.h.bf16 %v1225_v24 }
  0x15   : > { %526 = vst.msk [vmem:[#allocation3 + $0x29] sm:$0x1] %vm186_vm1, %v1293_v1  ;;  %527 = vst.msk [vmem:[#allocation3 + $0x39] sm:$0x1] %vm186_vm1, %v1293_v1  ;;  %v1226_v29 = vld [vmem:[%s1390_s18 + $0x40] sm:$0xff]   ;;  %v1227_v30 = vld [vmem:[%s1390_s18 + $0x48] sm:$0xff]  }
  0x16   : > { %528 = vst.msk [vmem:[#allocation3 + $0x49] sm:$0x1] %vm186_vm1, %v1293_v1  ;;  %529 = vst.msk [vmem:[#allocation3 + $0x59] sm:$0x1] %vm186_vm1, %v1293_v1  ;;  %v1189_v32 = vunpack.c.l.bf16 %v1226_v29  ;;  %v1190_v33 = vunpack.c.h.bf16 %v1226_v29  ;;  %v1193_v34 = vunpack.c.l.bf16 %v1227_v30  ;;  %v1228_v35 = vld [vmem:[%s1390_s18 + $0x50] sm:$0xff]   ;;  %v1229_v36 = vld [vmem:[%s1390_s18 + $0x58] sm:$0xff]   ;;  %v1194_v39 = vunpack.c.h.bf16 %v1227_v30 }
  0x17   : > { %530 = vst.msk [vmem:[#allocation3 + $0x69] sm:$0x1] %vm186_vm1, %v1293_v1  ;;  %531 = vst.msk [vmem:[#allocation3 + $0x79] sm:$0x1] %vm186_vm1, %v1293_v1  ;;  %v1230_v37 = vld [vmem:[%s1390_s18 + $0x60] sm:$0xff]   ;;  %v1197_v40 = vunpack.c.l.bf16 %v1228_v35  ;;  %v1198_v41 = vunpack.c.h.bf16 %v1228_v35  ;;  %v1231_v42 = vld [vmem:[%s1390_s18 + $0x68] sm:$0xff]   ;;  %v1201_v45 = vunpack.c.l.bf16 %v1229_v36  ;;  %v1202_v46 = vunpack.c.h.bf16 %v1229_v36 }
  0x18   : > { %532 = vst.msk [vmem:[#allocation3 + $0x89] sm:$0x1] %vm186_vm1, %v1293_v1  ;;  %188 = vst.msk [vmem:[#allocation2] sm:$0x1] %vm186_vm1, %v1292_v0  ;;  %v1232_v43 = vld [vmem:[%s1390_s18 + $0x70] sm:$0xff]   ;;  %v1233_v44 = vld [vmem:[%s1390_s18 + $0x78] sm:$0xff]   ;;  %v1205_v47 = vunpack.c.l.bf16 %v1230_v37  ;;  %v1206_v48 = vunpack.c.h.bf16 %v1230_v37  ;;  %v1209_v49 = vunpack.c.l.bf16 %v1231_v42  ;;  %v1210_v50 = vunpack.c.h.bf16 %v1231_v42 }
  0x19   : > { %510 = vst.msk [vmem:[#allocation3 + $0x8] sm:$0x3] %vm509_vm2, %v1293_v1  ;;  %513 = vst.msk [vmem:[#allocation3 + $0x98] sm:$0x3] %vm509_vm2, %v1293_v1  ;;  %v1213_v51 = vunpack.c.l.bf16 %v1232_v43  ;;  %v1214_v52 = vunpack.c.h.bf16 %v1232_v43  ;;  %v1217_v53 = vunpack.c.l.bf16 %v1233_v44  ;;  %v1218_v54 = vunpack.c.h.bf16 %v1233_v44  ;;  %s1143_s10 = sshll.u32 %s1604_s13, 1 }
  0x1a   : > { %514 = vst.msk [vmem:[#allocation3] sm:$0x1] %vm186_vm1, %v1293_v1  ;;  %523 = vst.msk [vmem:[#allocation3 + $0x90] sm:$0x1] %vm186_vm1, %v1293_v1  ;;  %vm938_vm13 = vcmask 60416   ;;  %vm947_vm14 = vcmask 64512   ;;  %s181_s15 = scalar_lea.vmem %s1601_s3, %s1143_s10 }
  0x1b   : > { %524 = vst.msk [vmem:[#allocation3 + $0x9] sm:$0x1] %vm186_vm1, %v1293_v1  ;;  %533 = vst.msk [vmem:[#allocation3 + $0x99] sm:$0x1] %vm186_vm1, %v1293_v1  ;;  %vm998_vm15 = vcmask 1040384  }
  0x1c   : > { %270 = vst.msk [vmem:[#allocation2 + $0x19] sm:$0xff] %vm183_vm0, %v1157_v5  ;;  %271 = vst.msk [vmem:[#allocation2 + $0x21] sm:$0xff] %vm183_vm0, %v1158_v6 }
  0x1d   : > { %272 = vst.msk [vmem:[#allocation2 + $0x31] sm:$0xff] %vm183_vm0, %v1161_v7  ;;  %273 = vst.msk [vmem:[#allocation2 + $0x39] sm:$0xff] %vm183_vm0, %v1162_v8 }
  0x1e   : > { %274 = vst.msk [vmem:[#allocation2 + $0x49] sm:$0xff] %vm183_vm0, %v1165_v13  ;;  %275 = vst.msk [vmem:[#allocation2 + $0x51] sm:$0xff] %vm183_vm0, %v1166_v14 }
  0x1f   : > { %v302_v18 = vld [vmem:[#allocation2] ss:$2 sm:$0xff]  ;;  %276 = vst.msk [vmem:[#allocation2 + $0x61] sm:$0xff] %vm183_vm0, %v1169_v15  ;;  %277 = vst.msk [vmem:[#allocation2 + $0x69] sm:$0xff] %vm183_vm0, %v1170_v16 }
  0x20   : > { %v333_v25 = vmax.f32 %v302_v18, %v318_v12  ;;  %278 = vst.msk [vmem:[#allocation2 + $0x79] sm:$0xff] %vm183_vm0, %v1173_v20  ;;  %279 = vst.msk [vmem:[#allocation2 + $0x81] sm:$0xff] %vm183_vm0, %v1174_v21 }
  0x21   : > { %280 = vst.msk [vmem:[#allocation2 + $0x91] sm:$0xff] %vm183_vm0, %v1177_v22  ;;  %281 = vst.msk [vmem:[#allocation2 + $0x99] sm:$0xff] %vm183_vm0, %v1178_v23 }
  0x22   : > { %v357_v38 = vmax.f32 %v333_v25, %v342_v19  ;;  %282 = vst.msk [vmem:[#allocation2 + $0xa9] sm:$0xff] %vm183_vm0, %v1181_v26  ;;  %283 = vst.msk [vmem:[#allocation2 + $0xb1] sm:$0xff] %vm183_vm0, %v1182_v27 }
  0x23   : > { %284 = vst.msk [vmem:[#allocation2 + $0xc1] sm:$0xff] %vm183_vm0, %v1185_v28  ;;  %285 = vst.msk [vmem:[#allocation2 + $0xc9] sm:$0xff] %vm183_vm0, %v1186_v31  ;;  %v365_v55 = vld [vmem:[#allocation2 + $0x18] ss:$2 sm:$0xff]  ;;  %v389_v56 = vld [vmem:[#allocation2 + $0x19] ss:$2 sm:$0xff] }
  0x24   : > { %286 = vst.msk [vmem:[#allocation2 + $0xd9] sm:$0xff] %vm183_vm0, %v1189_v32  ;;  %287 = vst.msk [vmem:[#allocation2 + $0xe1] sm:$0xff] %vm183_vm0, %v1190_v33  ;;  %v380_v57 = vmax.f32 %v357_v38, %v365_v55  ;;  %v413_v58 = vld [vmem:[#allocation2 + $0x1a] ss:$2 sm:$0xff]  ;;  %v320_v61 = vld [vmem:[#allocation2 + $0x31] ss:$2 sm:$0xff] }
  0x25   : > { %288 = vst.msk [vmem:[#allocation2 + $0xf1] sm:$0xff] %vm183_vm0, %v1193_v34  ;;  %289 = vst.msk [vmem:[#allocation2 + $0xf9] sm:$0xff] %vm183_vm0, %v1194_v39  ;;  %v304_v59 = vld [vmem:[#allocation2 + $0x30] ss:$2 sm:$0xff]  ;;  %v461_v9 = vld [vmem:[#allocation2 + $0x31] ss:$2 sm:$0xff] }
  0x26   : > { %290 = vst.msk [vmem:[#allocation2 + $0x109] sm:$0xff] %vm183_vm0, %v1197_v40  ;;  %291 = vst.msk [vmem:[#allocation2 + $0x111] sm:$0xff] %vm183_vm0, %v1198_v41  ;;  %v306_v60 = vld [vmem:[#allocation2 + $0x60] ss:$2 sm:$0xff]  ;;  %v404_v62 = vmax.f32 %v380_v57, %v389_v56  ;;  %v322_v63 = vld [vmem:[#allocation2 + $0x61] ss:$2 sm:$0xff]  ;;  %v334_v0 = vmax.f32 %v304_v59, %v320_v61 }
  0x27   : > { %292 = vst.msk [vmem:[#allocation2 + $0x121] sm:$0xff] %vm183_vm0, %v1201_v45  ;;  %293 = vst.msk [vmem:[#allocation2 + $0x129] sm:$0xff] %vm183_vm0, %v1202_v46  ;;  %v344_v1 = vld [vmem:[#allocation2 + $0x32] ss:$2 sm:$0xff]  ;;  %v346_v2 = vld [vmem:[#allocation2 + $0x62] ss:$2 sm:$0xff]  ;;  %v335_v4 = vmax.f32 %v306_v60, %v322_v63 }
  0x28   : > { %294 = vst.msk [vmem:[#allocation2 + $0x139] sm:$0xff] %vm183_vm0, %v1205_v47  ;;  %295 = vst.msk [vmem:[#allocation2 + $0x141] sm:$0xff] %vm183_vm0, %v1206_v48  ;;  %v437_v3 = vld [vmem:[#allocation2 + $0x30] ss:$2 sm:$0xff]  ;;  %v428_v6 = vmax.f32 %v404_v62, %v413_v58  ;;  %v358_v7 = vmax.f32 %v334_v0, %v344_v1  ;;  %v391_v11 = vld [vmem:[#allocation2 + $0x49] ss:$2 sm:$0xff] }
  0x29   : > { %296 = vst.msk [vmem:[#allocation2 + $0x151] sm:$0xff] %vm183_vm0, %v1209_v49  ;;  %297 = vst.msk [vmem:[#allocation2 + $0x159] sm:$0xff] %vm183_vm0, %v1210_v50  ;;  %v367_v5 = vld [vmem:[#allocation2 + $0x48] ss:$2 sm:$0xff]  ;;  %v369_v8 = vld [vmem:[#allocation2 + $0x78] ss:$2 sm:$0xff]  ;;  %v359_v10 = vmax.f32 %v335_v4, %v346_v2 }
  0x2a   : > { %298 = vst.msk [vmem:[#allocation2 + $0x169] sm:$0xff] %vm183_vm0, %v1213_v51  ;;  %299 = vst.msk [vmem:[#allocation2 + $0x171] sm:$0xff] %vm183_vm0, %v1214_v52  ;;  %v452_v12 = vmax.f32 %v428_v6, %v437_v3  ;;  %v485_v13 = vld [vmem:[#allocation2 + $0x32] ss:$2 sm:$0xff]  ;;  %v381_v14 = vmax.f32 %v358_v7, %v367_v5  ;;  %v393_v15 = vld [vmem:[#allocation2 + $0x79] ss:$2 sm:$0xff] }
  0x2b   : > { %300 = vst.msk [vmem:[#allocation2 + $0x181] sm:$0xff] %vm183_vm0, %v1217_v53  ;;  %301 = vst.msk [vmem:[#allocation2 + $0x189] sm:$0xff] %vm183_vm0, %v1218_v54  ;;  %v415_v16 = vld [vmem:[#allocation2 + $0x4a] ss:$2 sm:$0xff]  ;;  %v382_v17 = vmax.f32 %v359_v10, %v369_v8  ;;  %v324_v19 = vld [vmem:[#allocation2 + $0x91] ss:$2 sm:$0xff] }
  0x2c   : > { %v308_v18 = vld [vmem:[#allocation2 + $0x90] ss:$2 sm:$0xff]  ;;  %v476_v21 = vmax.f32 %v452_v12, %v461_v9  ;;  %v405_v22 = vmax.f32 %v381_v14, %v391_v11  ;;  %v439_v24 = vld [vmem:[#allocation2 + $0x60] ss:$2 sm:$0xff]  ;;  %v463_v28 = vld [vmem:[#allocation2 + $0x61] ss:$2 sm:$0xff] }
  0x2d   : > { %v348_v20 = vld [vmem:[#allocation2 + $0x92] ss:$2 sm:$0xff]  ;;  %v336_v25 = vmax.f32 %v308_v18, %v324_v19  ;;  %v406_v26 = vmax.f32 %v382_v17, %v393_v15  ;;  %v326_v34 = vld [vmem:[#allocation2 + $0xc1] ss:$2 sm:$0xff]  ;;  %v350_v35 = vld [vmem:[#allocation2 + $0xc2] ss:$2 sm:$0xff] }
  0x2e   : > { %v417_v23 = vld [vmem:[#allocation2 + $0x7a] ss:$2 sm:$0xff]  ;;  %v500_v30 = vmax.f32 %v476_v21, %v485_v13  ;;  %v429_v31 = vmax.f32 %v405_v22, %v415_v16  ;;  %v465_v37 = vld [vmem:[#allocation2 + $0x91] ss:$2 sm:$0xff]  ;;  %v419_v44 = vld [vmem:[#allocation2 + $0xaa] ss:$2 sm:$0xff] }
  0x2f   : > { %v441_v27 = vld [vmem:[#allocation2 + $0x90] ss:$2 sm:$0xff]  ;;  %v360_v32 = vmax.f32 %v336_v25, %v348_v20  ;;  %v310_v33 = vld [vmem:[#allocation2 + $0xc0] ss:$2 sm:$0xff]  ;;  %v430_v36 = vmax.f32 %v406_v26, %v417_v23  ;;  %v395_v39 = vld [vmem:[#allocation2 + $0xa9] ss:$2 sm:$0xff] }
  0x30   : > { %v371_v29 = vld [vmem:[#allocation2 + $0xa8] ss:$2 sm:$0xff]  ;;  %v337_v40 = vmax.f32 %v310_v33, %v326_v34  ;;  %535 = vst.msk [vmem:[#allocation3 + $0x11] sm:$0xff] %vm183_vm0, %v500_v30  ;;  %v453_v41 = vmax.f32 %v429_v31, %v439_v24  ;;  %v373_v45 = vld [vmem:[#allocation2 + $0xd8] ss:$2 sm:$0xff] }
  0x31   : > { %v487_v38 = vld [vmem:[#allocation2 + $0x62] ss:$2 sm:$0xff]  ;;  %v489_v42 = vld [vmem:[#allocation2 + $0x92] ss:$2 sm:$0xff]  ;;  %v383_v43 = vmax.f32 %v360_v32, %v371_v29  ;;  %v397_v46 = vld [vmem:[#allocation2 + $0xd9] ss:$2 sm:$0xff]  ;;  %v454_v47 = vmax.f32 %v430_v36, %v441_v27 }
  0x32   : > { %v361_v48 = vmax.f32 %v337_v40, %v350_v35  ;;  %v312_v49 = vld [vmem:[#allocation2 + $0xf0] ss:$2 sm:$0xff]  ;;  %v314_v50 = vld [vmem:[#allocation2 + $0x120] ss:$2 sm:$0xff]  ;;  %v328_v51 = vld [vmem:[#allocation2 + $0xf1] ss:$2 sm:$0xff]  ;;  %v477_v52 = vmax.f32 %v453_v41, %v463_v28 }
  0x33   : > { %v407_v53 = vmax.f32 %v383_v43, %v395_v39  ;;  %v330_v54 = vld [vmem:[#allocation2 + $0x121] ss:$2 sm:$0xff]  ;;  %v338_v55 = vmax.f32 %v312_v49, %v328_v51  ;;  %v352_v56 = vld [vmem:[#allocation2 + $0xf2] ss:$2 sm:$0xff]  ;;  %v354_v57 = vld [vmem:[#allocation2 + $0x122] ss:$2 sm:$0xff]  ;;  %v478_v60 = vmax.f32 %v454_v47, %v465_v37 }
  0x34   : > { %v559_v58 = vld [vmem:[#allocation3 + $0x1] sm:$0xff]  ;;  %v384_v62 = vmax.f32 %v361_v48, %v373_v45  ;;  %v339_v63 = vmax.f32 %v314_v50, %v330_v54  ;;  %v375_v0 = vld [vmem:[#allocation2 + $0x108] ss:$2 sm:$0xff]  ;;  %v501_v1 = vmax.f32 %v477_v52, %v487_v38  ;;  %v467_v3 = vld [vmem:[#allocation2 + $0xc1] ss:$2 sm:$0xff] }
  0x35   : > { %v592_v59 = vld [vmem:[#allocation3 + $0x2] sm:$0xff]  ;;  %v431_v2 = vmax.f32 %v407_v53, %v419_v44  ;;  %v362_v5 = vmax.f32 %v338_v55, %v352_v56  ;;  %v502_v8 = vmax.f32 %v478_v60, %v489_v42  ;;  %v491_v9 = vld [vmem:[#allocation2 + $0xc2] ss:$2 sm:$0xff]  ;;  %v399_v13 = vld [vmem:[#allocation2 + $0x109] ss:$2 sm:$0xff] }
  0x36   : > { %v443_v61 = vld [vmem:[#allocation2 + $0xc0] ss:$2 sm:$0xff]  ;;  %v543_v7 = vld [vmem:[#allocation3] sm:$0xff]  ;;  %v408_v10 = vmax.f32 %v384_v62, %v397_v46  ;;  %v363_v12 = vmax.f32 %v339_v63, %v354_v57  ;;  %536 = vst.msk [vmem:[#allocation3 + $0x21] sm:$0xff] %vm183_vm0, %v501_v1  ;;  %v471_v44 = vld [vmem:[#allocation2 + $0x121] ss:$2 sm:$0xff] }
  0x37   : > { %v421_v4 = vld [vmem:[#allocation2 + $0xda] ss:$2 sm:$0xff]  ;;  %v455_v14 = vmax.f32 %v431_v2, %v443_v61  ;;  %v469_v15 = vld [vmem:[#allocation2 + $0xf1] ss:$2 sm:$0xff]  ;;  %v385_v16 = vmax.f32 %v362_v5, %v375_v0  ;;  %v423_v18 = vld [vmem:[#allocation2 + $0x10a] ss:$2 sm:$0xff] }
  0x38   : > { %v377_v6 = vld [vmem:[#allocation2 + $0x138] ss:$2 sm:$0xff]  ;;  %v401_v17 = vld [vmem:[#allocation2 + $0x139] ss:$2 sm:$0xff]  ;;  %v1442_v20 = vld [vmem:[#allocation3 + $0x11] sm:$0xff]  ;;  %537 = vst.msk [vmem:[#allocation3 + $0x31] sm:$0xff] %vm183_vm0, %v502_v8  ;;  %v432_v23 = vmax.f32 %v408_v10, %v421_v4 }
  0x39   : > { %v445_v11 = vld [vmem:[#allocation2 + $0xf0] ss:$2 sm:$0xff]  ;;  %v1447_v22 = vld [vmem:[#allocation3 + $0x10] sm:$0xff]  ;;  %v386_v24 = vmax.f32 %v363_v12, %v377_v6  ;;  %v567_v25 = vpack.c.bf16 %v1442_v20, %v559_v58  ;;  %v479_v27 = vmax.f32 %v455_v14, %v467_v3  ;;  %v409_v28 = vmax.f32 %v385_v16, %v399_v13  ;;  %v332_v30 = vld [vmem:[#allocation2 + $0x151] ss:$2 sm:$0xff] }
  0x3a   : > { %v425_v19 = vld [vmem:[#allocation2 + $0x13a] ss:$2 sm:$0xff]  ;;  %v1444_v21 = vld [vmem:[#allocation3 + $0x12] sm:$0xff]  ;;  %v456_v32 = vmax.f32 %v432_v23, %v445_v11  ;;  %v551_v36 = vpack.c.bf16 %v1447_v22, %v543_v7 }
  0x3b   : > { %v600_v26 = vpack.c.bf16 %v1444_v21, %v592_v59  ;;  %v316_v29 = vld [vmem:[#allocation2 + $0x150] ss:$2 sm:$0xff]  ;;  %v410_v33 = vmax.f32 %v386_v24, %v401_v17  ;;  %v447_v34 = vld [vmem:[#allocation2 + $0x120] ss:$2 sm:$0xff]  ;;  %575 = vrot.lane.b32.xlu0 %v567_v25, %s1294_s19  ;;  %v503_v37 = vmax.f32 %v479_v27, %v491_v9  ;;  %v433_v39 = vmax.f32 %v409_v28, %v423_v18  ;;  %v473_v45 = vld [vmem:[#allocation2 + $0x151] ss:$2 sm:$0xff] }
  0x3c   : > { %v356_v31 = vld [vmem:[#allocation2 + $0x152] ss:$2 sm:$0xff]  ;;  %v340_v35 = vmax.f32 %v316_v29, %v332_v30  ;;  %v480_v42 = vmax.f32 %v456_v32, %v469_v15  ;;  %555 = vst.msk [vmem:[#allocation4] sm:$0xff] %vm183_vm0, %v551_v36  ;;  %v495_v48 = vld [vmem:[#allocation2 + $0x122] ss:$2 sm:$0xff] }
  0x3d   : > { %608 = vrot.lane.b32.xlu1 %v600_v26, %s1295_s20  ;;  %v493_v38 = vld [vmem:[#allocation2 + $0xf2] ss:$2 sm:$0xff]  ;;  %v434_v43 = vmax.f32 %v410_v33, %v425_v19  ;;  %538 = vst.msk [vmem:[#allocation3 + $0x41] sm:$0xff] %vm183_vm0, %v503_v37  ;;  %v457_v47 = vmax.f32 %v433_v39, %v447_v34  ;;  %v403_v50 = vld [vmem:[#allocation2 + $0x169] ss:$2 sm:$0xff] }
  0x3e   : > { %v449_v40 = vld [vmem:[#allocation2 + $0x150] ss:$2 sm:$0xff]  ;;  %v364_v46 = vmax.f32 %v340_v35, %v356_v31  ;;  %v504_v54 = vmax.f32 %v480_v42, %v493_v38  ;;  %v451_v6 = vld [vmem:[#allocation2 + $0x180] ss:$2 sm:$0xff]  ;;  %v475_v10 = vld [vmem:[#allocation2 + $0x181] ss:$2 sm:$0xff] }
  0x3f   : > { %v379_v41 = vld [vmem:[#allocation2 + $0x168] ss:$2 sm:$0xff]  ;;  %v561_v51 = vld [vmem:[#allocation3 + $0x21] sm:$0xff]  ;;  %v458_v55 = vmax.f32 %v434_v43, %v449_v40  ;;  %v481_v60 = vmax.f32 %v457_v47, %v471_v44 }
  0x40   : > { %v497_v49 = vld [vmem:[#allocation2 + $0x152] ss:$2 sm:$0xff]  ;;  %v387_v56 = vmax.f32 %v364_v46, %v379_v41  ;;  %v562_v57 = vld [vmem:[#allocation3 + $0x31] sm:$0xff]  ;;  %539 = vst.msk [vmem:[#allocation3 + $0x51] sm:$0xff] %vm183_vm0, %v504_v54  ;;  %v666_v13 = vpack.c.bf16 %v561_v51, %v1442_v20 }
  0x41   : > { %v594_v52 = vld [vmem:[#allocation3 + $0x22] sm:$0xff]  ;;  %v595_v58 = vld [vmem:[#allocation3 + $0x32] sm:$0xff]  ;;  %v1456_v61 = vpack.c.bf16 %v562_v57, %v561_v51  ;;  %v482_v0 = vmax.f32 %v458_v55, %v473_v45  ;;  %v505_v2 = vmax.f32 %v481_v60, %v495_v48 }
  0x42   : > { %v626_v53 = vld [vmem:[#allocation3 + $0x20] sm:$0xff]  ;;  %v627_v59 = vld [vmem:[#allocation3 + $0x30] sm:$0xff]  ;;  %v1458_v62 = vpack.c.bf16 %v595_v58, %v594_v52  ;;  %v411_v3 = vmax.f32 %v387_v56, %v403_v50  ;;  %v699_v23 = vpack.c.bf16 %v594_v52, %v1444_v21  ;;  %v1281_v27 = vld [vmem:[%s1599_s1] sm:$0xff]  }
  0x43   : > { %v733_v63 = vpack.c.bf16 %v627_v59, %v626_v53  ;;  %v427_v1 = vld [vmem:[#allocation2 + $0x16a] ss:$2 sm:$0xff]  ;;  %577 = vrot.lane.b32.xlu0 %v1456_v61, %s1294_s19  ;;  %v633_v4 = vpack.c.bf16 %v626_v53, %v1447_v22  ;;  %v506_v5 = vmax.f32 %v482_v0, %v497_v49  ;;  %540 = vst.msk [vmem:[#allocation3 + $0x61] sm:$0xff] %vm183_vm0, %v505_v2 }
  0x44   : > { %610 = vrot.lane.b32.xlu1 %v1458_v62, %s1295_s20  ;;  %v435_v7 = vmax.f32 %v411_v3, %v427_v1  ;;  %v628_v8 = vld [vmem:[#allocation3 + $0x40] sm:$0xff]  ;;  %v499_v14 = vld [vmem:[#allocation2 + $0x182] ss:$2 sm:$0xff]  ;;  %1241 = vmatprep.subr.bf16.mxu0 %v1281_v27 }
  0x45   : > { %556 = vst.msk [vmem:[#allocation4 + $0x8] sm:$0xff] %vm183_vm0, %v733_v63  ;;  %v661_v9 = vld [vmem:[#allocation3 + $0x41] sm:$0xff]  ;;  %541 = vst.msk [vmem:[#allocation3 + $0x71] sm:$0xff] %vm183_vm0, %v506_v5  ;;  %v634_v11 = vpack.c.bf16 %v628_v8, %v627_v59  ;;  %1242 = vmatpush3.bf16.msra.mxu0 %v1281_v27  ;;  %v1282_v21 = vld [vmem:[%s1599_s1 + $0x8] sm:$0xff]   ;;  %1255 = vmatprep.subr.bf16.mxu1 %v1281_v27 }
  0x46   : > { %v459_v12 = vmax.f32 %v435_v7, %v451_v6  ;;  %v667_v15 = vpack.c.bf16 %v661_v9, %v562_v57  ;;  %v694_v18 = vld [vmem:[#allocation3 + $0x42] sm:$0xff]  ;;  %1243 = vmatprep.subr.bf16.mxu0 %v1282_v21  ;;  %1258 = vmatpush3.bf16.msra.mxu1 %v1281_v27  ;;  %v1283_v30 = vld [vmem:[%s1599_s1 + $0x10] ss:$0 sps:$4 sm:$0x33]   ;;  %v732_v49 = vld [vmem:[#allocation3 + $0x90] sm:$0xff] }
  0x47   : > { %641 = vrot.lane.b32.xlu0 %v633_v4, %s1296_s21  ;;  %v1472_v16 = vld [vmem:[#allocation3 + $0x50] sm:$0xff]  ;;  %v700_v20 = vpack.c.bf16 %v694_v18, %v595_v58  ;;  %1256 = vmatprep.subr.bf16.mxu1 %v1282_v21  ;;  %v863_v31 = vsel %vm861_vm3, %v1283_v30, 0 }
  0x48   : > { %643 = vrot.lane.b32.xlu1 %v634_v11, %s1296_s21  ;;  %v483_v17 = vmax.f32 %v459_v12, %v475_v10  ;;  %v734_v19 = vpack.c.bf16 %v1472_v16, %v628_v8  ;;  %v761_v28 = vld [vmem:[#allocation3 + $0x51] sm:$0xff] }
  0x49   : > { %v767_v29 = vpack.c.bf16 %v761_v28, %v661_v9  ;;  %1244 = vmatpush3.bf16.msra.mxu0 %v1282_v21  ;;  %v794_v32 = vld [vmem:[#allocation3 + $0x52] sm:$0xff] }
  0x4a   : > { %v507_v22 = vmax.f32 %v483_v17, %v499_v14  ;;  %557 = vst.msk [vmem:[#allocation4 + $0x10] sm:$0xff] %vm183_vm0, %v734_v19  ;;  %v630_v24 = vld [vmem:[#allocation3 + $0x60] sm:$0xff]  ;;  %1261 = vmatprep.subr.msk.bf16.mxu0 %vm861_vm3, %v1283_v30  ;;  %1259 = vmatpush3.bf16.msra.mxu1 %v1282_v21  ;;  %v800_v35 = vpack.c.bf16 %v794_v32, %v694_v18  ;;  %v765_v51 = vld [vmem:[#allocation3 + $0x91] sm:$0xff] }
  0x4b   : > { %674 = vrot.lane.b32.xlu0 %v666_v13, %s1297_s22  ;;  %1262 = vmatprep.subr.msk.bf16.mxu1 %vm861_vm3, %v1283_v30  ;;  %v565_v33 = vld [vmem:[#allocation3 + $0x61] sm:$0xff]  ;;  %v635_v41 = vpack.c.bf16 %v630_v24, %v1472_v16  ;;  %v798_v53 = vld [vmem:[#allocation3 + $0x92] sm:$0xff] }
  0x4c   : > { %676 = vrot.lane.b32.xlu1 %v667_v15, %s1297_s22  ;;  %542 = vst.msk [vmem:[#allocation3 + $0x81] sm:$0xff] %vm183_vm0, %v507_v22  ;;  %v631_v25 = vld [vmem:[#allocation3 + $0x70] sm:$0xff]  ;;  %v598_v37 = vld [vmem:[#allocation3 + $0x62] sm:$0xff]  ;;  %v668_v44 = vpack.c.bf16 %v565_v33, %v761_v28 }
  0x4d   : > { %v735_v26 = vpack.c.bf16 %v631_v25, %v630_v24  ;;  %v566_v34 = vld [vmem:[#allocation3 + $0x71] sm:$0xff]  ;;  %1246 = vmatpush3.bf16.msra.mxu0 %v863_v31  ;;  %v701_v47 = vpack.c.bf16 %v598_v37, %v794_v32 }
  0x4e   : > { %1260 = vmatpush3.bf16.msra.mxu1 %v863_v31  ;;  %v570_v36 = vpack.c.bf16 %v566_v34, %v565_v33  ;;  %v599_v38 = vld [vmem:[#allocation3 + $0x72] sm:$0xff] }
  0x4f   : > { %707 = vrot.lane.b32.xlu0 %v699_v23, %s1298_s25  ;;  %558 = vst.msk [vmem:[#allocation4 + $0x18] sm:$0xff] %vm183_vm0, %v735_v26  ;;  %v603_v39 = vpack.c.bf16 %v599_v38, %v598_v37  ;;  %vm1000_vm0 = vcmask 58368  }
  0x50   : > { %709 = vrot.lane.b32.xlu1 %v700_v20, %s1298_s25 }
  0x53   : > { %741 = vrot.lane.b32.xlu0 %v733_v63, %s1299_s28  ;;  %v632_v40 = vld [vmem:[#allocation3 + $0x80] sm:$0xff] }
  0x54   : > { %743 = vrot.lane.b32.xlu1 %v734_v19, %s1299_s28  ;;  %v636_v42 = vpack.c.bf16 %v632_v40, %v631_v25  ;;  %v665_v43 = vld [vmem:[#allocation3 + $0x81] sm:$0xff]  ;;  %v736_v50 = vpack.c.bf16 %v732_v49, %v632_v40 }
  0x55   : > { %v669_v45 = vpack.c.bf16 %v665_v43, %v566_v34  ;;  %v698_v46 = vld [vmem:[#allocation3 + $0x82] sm:$0xff]  ;;  %v769_v52 = vpack.c.bf16 %v765_v51, %v665_v43 }
  0x56   : > { %v702_v48 = vpack.c.bf16 %v698_v46, %v599_v38  ;;  %v802_v54 = vpack.c.bf16 %v798_v53, %v698_v46 }
  0x57   : > { %774 = vrot.lane.b32.xlu0 %v1456_v61, %s1300_s4 }
  0x58   : > { %776 = vrot.lane.b32.xlu1 %v767_v29, %s1300_s4 }
  0x5b   : > { %807 = vrot.lane.b32.xlu0 %v1458_v62, %s1301_s5 }
  0x5c   : > { %579 = vrot.lane.b32.xlu1 %v767_v29, %s1294_s19 }
  0x5f   : > { %809 = vrot.lane.b32.xlu0 %v800_v35, %s1301_s5 }
  0x60   : > { %581 = vrot.lane.b32.xlu1 %v570_v36, %s1294_s19 }
  0x63   : > { %612 = vrot.lane.b32.xlu0 %v800_v35, %s1295_s20 }
  0x64   : > { %614 = vrot.lane.b32.xlu1 %v603_v39, %s1295_s20 }
  0x67   : > { %645 = vrot.lane.b32.xlu0 %v635_v41, %s1296_s21 }
  0x68   : > { %647 = vrot.lane.b32.xlu1 %v636_v42, %s1296_s21 }
  0x6b   : > { %678 = vrot.lane.b32.xlu0 %v668_v44, %s1297_s22 }
  0x6c   : > { %680 = vrot.lane.b32.xlu1 %v669_v45, %s1297_s22 }
  0x6f   : > { %711 = vrot.lane.b32.xlu0 %v701_v47, %s1298_s25 }
  0x70   : > { %713 = vrot.lane.b32.xlu1 %v702_v48, %s1298_s25 }
  0x73   : > { %745 = vrot.lane.b32.xlu0 %v735_v26, %s1299_s28 }
  0x74   : > { %747 = vrot.lane.b32.xlu1 %v736_v50, %s1299_s28 }
  0x77   : > { %778 = vrot.lane.b32.xlu0 %v570_v36, %s1300_s4 }
  0x78   : > { %780 = vrot.lane.b32.xlu1 %v769_v52, %s1300_s4 }
  0x7b   : > { %811 = vrot.lane.b32.xlu0 %v603_v39, %s1301_s5 }
  0x7c   : > { %813 = vrot.lane.b32.xlu1 %v802_v54, %s1301_s5 }
  0xad   : > { %v576_v55 = vpop.permute.xlu0 %575 }
  0xae   : > { %588 = vst.msk [vmem:[#allocation4] sm:$0xff] %vm587_vm4, %v576_v55 }
  0xaf   : > { %v609_v56 = vpop.permute.xlu1 %608 }
  0xb0   : > { %621 = vst.msk [vmem:[#allocation4] sm:$0xff] %vm620_vm5, %v609_v56 }
  0xb5   : > { %v578_v57 = vpop.permute.xlu0 %577 }
  0xb6   : > { %v611_v58 = vpop.permute.xlu1 %610  ;;  %589 = vst.msk [vmem:[#allocation4 + $0x8] sm:$0xff] %vm587_vm4, %v578_v57 }
  0xb7   : > { %622 = vst.msk [vmem:[#allocation4 + $0x8] sm:$0xff] %vm620_vm5, %v611_v58 }
  0xb9   : > { %v642_v59 = vpop.permute.xlu0 %641 }
  0xba   : > { %654 = vst.msk [vmem:[#allocation4] sm:$0xff] %vm653_vm6, %v642_v59  ;;  %v644_v60 = vpop.permute.xlu1 %643 }
  0xbb   : > { %655 = vst.msk [vmem:[#allocation4 + $0x8] sm:$0xff] %vm653_vm6, %v644_v60 }
  0xbd   : > { %v675_v61 = vpop.permute.xlu0 %674 }
  0xbe   : > { %687 = vst.msk [vmem:[#allocation4] sm:$0xff] %vm686_vm7, %v675_v61  ;;  %v677_v62 = vpop.permute.xlu1 %676 }
  0xbf   : > { %688 = vst.msk [vmem:[#allocation4 + $0x8] sm:$0xff] %vm686_vm7, %v677_v62 }
  0xc1   : > { %v708_v63 = vpop.permute.xlu0 %707 }
  0xc2   : > { %720 = vst.msk [vmem:[#allocation4] sm:$0xff] %vm719_vm8, %v708_v63  ;;  %v710_v0 = vpop.permute.xlu1 %709 }
  0xc3   : > { %721 = vst.msk [vmem:[#allocation4 + $0x8] sm:$0xff] %vm719_vm8, %v710_v0 }
  0xc5   : > { %v742_v1 = vpop.permute.xlu0 %741 }
  0xc6   : > { %754 = vst.msk [vmem:[#allocation4] sm:$0xff] %vm753_vm9, %v742_v1  ;;  %v744_v2 = vpop.permute.xlu1 %743 }
  0xc7   : > { %755 = vst.msk [vmem:[#allocation4 + $0x8] sm:$0xff] %vm753_vm9, %v744_v2 }
  0xc9   : > { %v775_v3 = vpop.permute.xlu0 %774 }
  0xca   : > { %787 = vst.msk [vmem:[#allocation4] sm:$0xff] %vm786_vm10, %v775_v3  ;;  %v777_v4 = vpop.permute.xlu1 %776 }
  0xcb   : > { %788 = vst.msk [vmem:[#allocation4 + $0x8] sm:$0xff] %vm786_vm10, %v777_v4 }
  0xcd   : > { %v808_v5 = vpop.permute.xlu0 %807 }
  0xce   : > { %820 = vst.msk [vmem:[#allocation4] sm:$0xff] %vm819_vm11, %v808_v5  ;;  %v580_v6 = vpop.permute.xlu1 %579 }
  0xcf   : > { %590 = vst.msk [vmem:[#allocation4 + $0x10] sm:$0xff] %vm587_vm4, %v580_v6 }
  0xd1   : > { %v810_v7 = vpop.permute.xlu0 %809 }
  0xd2   : > { %821 = vst.msk [vmem:[#allocation4 + $0x8] sm:$0xff] %vm819_vm11, %v810_v7  ;;  %v582_v8 = vpop.permute.xlu1 %581 }
  0xd3   : > { %591 = vst.msk [vmem:[#allocation4 + $0x18] sm:$0xff] %vm587_vm4, %v582_v8 }
  0xd5   : > { %v613_v9 = vpop.permute.xlu0 %612  ;;  %v824_v10 = vld [vmem:[#allocation4] sm:$0xff] }
  0xd6   : > { %623 = vst.msk [vmem:[#allocation4 + $0x10] sm:$0xff] %vm620_vm5, %v613_v9  ;;  %v615_v11 = vpop.permute.xlu1 %614  ;;  %1247 = vmatprep.mubr.msk.bf16.mxu0 %vm848_vm12, %v824_v10 }
  0xd7   : > { %624 = vst.msk [vmem:[#allocation4 + $0x18] sm:$0xff] %vm620_vm5, %v615_v11 }
  0xd9   : > { %v646_v12 = vpop.permute.xlu0 %645  ;;  %v825_v13 = vld [vmem:[#allocation4 + $0x8] sm:$0xff] }
  0xda   : > { %656 = vst.msk [vmem:[#allocation4 + $0x10] sm:$0xff] %vm653_vm6, %v646_v12  ;;  %v648_v14 = vpop.permute.xlu1 %647  ;;  %1248 = vmatmul.mubr.msk.bf16.vlgmr.msra.gmra.mrb[0].mxu0 %vm848_vm12, %v825_v13 }
  0xdb   : > { %657 = vst.msk [vmem:[#allocation4 + $0x18] sm:$0xff] %vm653_vm6, %v648_v14 }
  0xdd   : > { %v679_v15 = vpop.permute.xlu0 %678 }
  0xde   : > { %689 = vst.msk [vmem:[#allocation4 + $0x10] sm:$0xff] %vm686_vm7, %v679_v15  ;;  %v681_v16 = vpop.permute.xlu1 %680 }
  0xdf   : > { %690 = vst.msk [vmem:[#allocation4 + $0x18] sm:$0xff] %vm686_vm7, %v681_v16 }
  0xe1   : > { %v712_v17 = vpop.permute.xlu0 %711 }
  0xe2   : > { %722 = vst.msk [vmem:[#allocation4 + $0x10] sm:$0xff] %vm719_vm8, %v712_v17  ;;  %v714_v18 = vpop.permute.xlu1 %713 }
  0xe3   : > { %723 = vst.msk [vmem:[#allocation4 + $0x18] sm:$0xff] %vm719_vm8, %v714_v18 }
  0xe5   : > { %v746_v19 = vpop.permute.xlu0 %745 }
  0xe6   : > { %756 = vst.msk [vmem:[#allocation4 + $0x10] sm:$0xff] %vm753_vm9, %v746_v19  ;;  %v748_v22 = vpop.permute.xlu1 %747 }
  0xe7   : > { %757 = vst.msk [vmem:[#allocation4 + $0x18] sm:$0xff] %vm753_vm9, %v748_v22 }
  0xe9   : > { %v779_v23 = vpop.permute.xlu0 %778 }
  0xea   : > { %789 = vst.msk [vmem:[#allocation4 + $0x10] sm:$0xff] %vm786_vm10, %v779_v23  ;;  %v781_v20 = vpop.permute.xlu1 %780 }
  0xeb   : > { %790 = vst.msk [vmem:[#allocation4 + $0x18] sm:$0xff] %vm786_vm10, %v781_v20 }
  0xed   : > { %v812_v24 = vpop.permute.xlu0 %811 }
  0xee   : > { %822 = vst.msk [vmem:[#allocation4 + $0x10] sm:$0xff] %vm819_vm11, %v812_v24  ;;  %v814_v25 = vpop.permute.xlu1 %813 }
  0xef   : > { %823 = vst.msk [vmem:[#allocation4 + $0x18] sm:$0xff] %vm819_vm11, %v814_v25 }
  0xf5   : > { %v826_v26 = vld [vmem:[#allocation4 + $0x10] sm:$0xff] }
  0xf6   : > { %1251 = vmatprep.mubr.msk.bf16.mxu1 %vm848_vm12, %v826_v26  ;;  %v827_v27 = vld [vmem:[#allocation4 + $0x18] sm:$0xff] }
  0xf7   : > { %1252 = vmatmul.mubr.msk.bf16.vlgmr.msra.gmra.mrb[0].mxu1 %vm848_vm12, %v827_v27 }
 0x1ad   : > { %v1249_v21 = vpop.f32.mrb[0].mxu0 }
 0x1ae   : > { %v932_v28 = vpack.c.bf16 %v1249_v21, %v1249_v21  ;;  %v899_v29 = vpop.f32.mrb[1].mxu0  ;;  %v971_v33 = vmul.f32 %v1249_v21, %v1249_v21  ;;  %v951_v41 = vsel %vm947_vm14, %v1249_v21, 0.0 }
 0x1af   : > { %v930_v30 = vpack.c.bf16 %v899_v29, %v899_v29  ;;  %v969_v31 = vmul.f32 %v899_v29, %v899_v29  ;;  %v1250_v32 = vpop.f32.mrb[2].mxu0  ;;  %v948_v36 = vsel %vm947_vm14, %v899_v29, 0.0 }
 0x1b0   : > { %941 = vst.msk [vmem:[%s1557_s9 + $0x8] sm:$0xf] %vm938_vm13, %v932_v28  ;;  %v933_v34 = vpack.c.bf16 %v1250_v32, %v1250_v32  ;;  %v902_v35 = vpop.f32.mrb[3].mxu0  ;;  %v972_v43 = vmul.f32 %v1250_v32, %v1250_v32  ;;  %v980_v47 = vsel %vm947_vm14, %v971_v33, 0.0  ;;  %v953_v48 = vsel %vm947_vm14, %v1250_v32, 0.0 }
 0x1b1   : > { %939 = vst.msk [vmem:[%s1557_s9] sm:$0xf] %vm938_vm13, %v930_v30  ;;  %v931_v37 = vpack.c.bf16 %v902_v35, %v902_v35  ;;  %v949_v38 = vsel %vm947_vm14, %v902_v35, 0.0  ;;  %v970_v39 = vmul.f32 %v902_v35, %v902_v35  ;;  %v977_v42 = vsel %vm947_vm14, %v969_v31, 0.0 }
 0x1b2   : > { %942 = vst.msk [vmem:[%s1557_s9 + $0xc] sm:$0xf] %vm938_vm13, %v933_v34  ;;  %v950_v40 = vadd.f32 %v949_v38, %v948_v36  ;;  %v982_v51 = vsel %vm947_vm14, %v972_v43, 0.0 }
 0x1b3   : > { %940 = vst.msk [vmem:[%s1557_s9 + $0x4] sm:$0xf] %vm938_vm13, %v931_v37  ;;  %v978_v44 = vsel %vm947_vm14, %v970_v39, 0.0 }
 0x1b4   : > { %v952_v45 = vadd.f32 %v951_v41, %v950_v40  ;;  %v979_v46 = vadd.f32 %v978_v44, %v977_v42 }
 0x1b6   : > { %v981_v49 = vadd.f32 %v980_v47, %v979_v46  ;;  %v954_v50 = vadd.f32 %v953_v48, %v952_v45 }
 0x1b8   : > { %v983_v52 = vadd.f32 %v982_v51, %v981_v49 }
 0x1ca   : > { %v1253_v53 = vpop.f32.mrb[0].mxu1 }
 0x1cb   : > { %v936_v54 = vpack.c.bf16 %v1253_v53, %v1253_v53  ;;  %v915_v55 = vpop.f32.mrb[1].mxu1  ;;  %v975_v2 = vmul.f32 %v1253_v53, %v1253_v53  ;;  %v959_v6 = vsel %vm947_vm14, %v1253_v53, 0.0 }
 0x1cc   : > { %v934_v56 = vpack.c.bf16 %v915_v55, %v915_v55  ;;  %v955_v57 = vsel %vm947_vm14, %v915_v55, 0.0  ;;  %v973_v58 = vmul.f32 %v915_v55, %v915_v55  ;;  %v1254_v59 = vpop.f32.mrb[2].mxu1 }
 0x1cd   : > { %945 = vst.msk [vmem:[%s1557_s9 + $0x18] sm:$0xf] %vm938_vm13, %v936_v54  ;;  %v956_v60 = vadd.f32 %v955_v57, %v954_v50  ;;  %v937_v61 = vpack.c.bf16 %v1254_v59, %v1254_v59  ;;  %v918_v62 = vpop.f32.mrb[3].mxu1  ;;  %v976_v7 = vmul.f32 %v1254_v59, %v1254_v59  ;;  %v961_v10 = vsel %vm947_vm14, %v1254_v59, 0.0 }
 0x1ce   : > { %943 = vst.msk [vmem:[%s1557_s9 + $0x10] sm:$0xf] %vm938_vm13, %v934_v56  ;;  %v984_v63 = vsel %vm947_vm14, %v973_v58, 0.0  ;;  %v935_v0 = vpack.c.bf16 %v918_v62, %v918_v62  ;;  %v957_v1 = vsel %vm947_vm14, %v918_v62, 0.0  ;;  %v974_v5 = vmul.f32 %v918_v62, %v918_v62 }
 0x1cf   : > { %v985_v3 = vadd.f32 %v984_v63, %v983_v52  ;;  %946 = vst.msk [vmem:[%s1557_s9 + $0x1c] sm:$0xf] %vm938_vm13, %v937_v61  ;;  %v958_v4 = vadd.f32 %v957_v1, %v956_v60  ;;  %v988_v12 = vsel %vm947_vm14, %v975_v2, 0.0  ;;  %v990_v15 = vsel %vm947_vm14, %v976_v7, 0.0 }
 0x1d0   : > { %944 = vst.msk [vmem:[%s1557_s9 + $0x14] sm:$0xf] %vm938_vm13, %v935_v0  ;;  %v986_v9 = vsel %vm947_vm14, %v974_v5, 0.0 }
 0x1d1   : > { %v960_v8 = vadd.f32 %v959_v6, %v958_v4  ;;  %v987_v11 = vadd.f32 %v986_v9, %v985_v3 }
 0x1d3   : > { %v962_v13 = vadd.f32 %v961_v10, %v960_v8  ;;  %v989_v14 = vadd.f32 %v988_v12, %v987_v11 }
 0x1d5   : > { %v963_v16 = vrot.slane %v962_v13, 4  ;;  %v991_v17 = vadd.f32 %v990_v15, %v989_v14 }
 0x1d7   : > { %v964_v18 = vadd.f32 %v963_v16, %v962_v13  ;;  %v992_v19 = vrot.slane %v991_v17, 4 }
 0x1d9   : > { %v965_v22 = vrot.slane %v964_v18, 2  ;;  %v993_v23 = vadd.f32 %v992_v19, %v991_v17 }
 0x1db   : > { %v966_v20 = vadd.f32 %v965_v22, %v964_v18  ;;  %v994_v24 = vrot.slane %v993_v23, 2 }
 0x1dd   : > { %v967_v25 = vrot.slane %v966_v20, 1  ;;  %v995_v26 = vadd.f32 %v994_v24, %v993_v23 }
 0x1df   : > { %v996_v27 = vrot.slane %v995_v26, 1  ;;  %v968_v21 = vadd.f32 %v967_v25, %v966_v20 }
 0x1e1   : > { %v997_v28 = vadd.f32 %v996_v27, %v995_v26 }
 0x1e3   : > { %v999_v29 = vsel %vm998_vm15, %v968_v21, %v997_v28 }
 0x1e4   : > { %1001 = vst.msk [vmem:[%s181_s15] sm:$0x3] %vm1000_vm0, %v999_v29 }
 0x1e5 PF: > { %s14_s12 = sadd.s32 1, %s1290_s12  }
 0x1e6   : > { %p11_p4 = scmp.ge.s32.totalorder %s14_s12, 4  }
 0x1e8   :  { %13 = sbr.rel (!%p11_p4) target bundleno = 1 (0x1), region = 144 }

</bundles_post_ra>
